<compile_context>
chip_gen: v5e
topology: v5e:2x2
jax: 0.10.0
libtpu: 0.0.40
codegen_flags: <defaults>
</compile_context>

<pallas_src>
import math
import functools

import jax
import jax.numpy as jnp
from jax.experimental import pallas as pl
from jax.experimental.pallas import tpu as pltpu


def _round_up(x: int, m: int) -> int:
    return ((x + m - 1) // m) * m


# ----------------------------------------------------------------------------
# Pallas kernel: projection + normalize + CLIP logits + softmax + expectation
# ----------------------------------------------------------------------------
def gigacount_kernel(feat_ref,     # VMEM (TP, Cin_p)  bf16 : image feature tile
                     wproj_ref,    # VMEM (Cin_p, D_p) bf16 : 1x1 conv weight
                     bproj_ref,    # VMEM (1, D_p)     f32  : 1x1 conv bias
                     tT_ref,       # VMEM (D_p, N_p)   bf16 : scale * norm(text), transposed
                     anchor_ref,   # VMEM (1, N_p)     f32  : anchor points (0 on padded bins)
                     mask_ref,     # VMEM (1, N_p)     f32  : 0 valid / -1e30 padded bins
                     out_ref,      # VMEM (TP, N_p)    f32  : logits; expected packed at n_col
                     *, n_col: int):
    # 1x1 conv == per-pixel matmul over channels (MXU, bf16 in / f32 accumulate).
    x = jnp.dot(feat_ref[...], wproj_ref[...],
                preferred_element_type=jnp.float32) + bproj_ref[...]

    # F.normalize(p=2, dim=-1, eps=1e-6): x / max(||x||, eps)  -- f32 VPU/EUP math.
    inv_norm = jax.lax.rsqrt(
        jnp.maximum(jnp.sum(x * x, axis=-1, keepdims=True), 1e-12))
    x_n = (x * inv_norm).astype(jnp.bfloat16)

    # CLIP logits. Text normalization, the clamped logit scale and the
    # transpose are grid-invariant and pre-folded into tT in the wrapper.
    logits = jnp.dot(x_n, tT_ref[...], preferred_element_type=jnp.float32)
    logits = logits + mask_ref[...]          # padded bins -> -1e30 (excluded below)

    # softmax over bins + expectation with anchor points (all f32).
    m = jnp.max(logits, axis=-1, keepdims=True)
    p = jnp.exp(logits - m)
    inv_den = pl.reciprocal(jnp.sum(p, axis=-1, keepdims=True), approx=True)
    probs = p * inv_den
    expected = jnp.sum(probs * anchor_ref[...], axis=-1, keepdims=True)

    # Lane-dense single store: pack the expected count into padded column n_col.
    lane = jax.lax.broadcasted_iota(jnp.int32, logits.shape, 1)
    out_ref[...] = jnp.where(lane == n_col, expected, logits)


# ----------------------------------------------------------------------------
# Wrapper
# ----------------------------------------------------------------------------
@functools.partial(jax.jit, static_argnames=("tile_p",))
def gigacount_head(feat_nchw, w_proj, b_proj, text_features, anchor_points,
                   logit_scale_param, tile_p=256):
    """
    feat_nchw         : (B, Cin, H, W)  fused feature map (already at target size)
    w_proj            : (Cin, D)        1x1 conv projection weight (transposed)
    b_proj            : (D,)            1x1 conv bias
    text_features     : (N, D)          text encoder output (unnormalized)
    anchor_points     : (N,)            bin anchor points
    logit_scale_param : ()              learnable log scale

    returns (logits (B, N, H, W), expected (B, 1, H, W))
    """
    B, Cin, H, W = feat_nchw.shape
    N, D = text_features.shape
    P = B * H * W

    Cin_p = _round_up(Cin, 128)          # e.g. 672 -> 768 at production shapes
    D_p = _round_up(D, 128)
    N_p = _round_up(N + 1, 128)          # +1 lane to pack the expected count
    P_p = _round_up(P, tile_p)

    # NCHW -> flattened channels-last (P, Cin), zero-padded to MXU/lane tiles.
    # TODO(synk): accept channels-last features from the upstream fusion module
    # to avoid this XLA-side transpose/copy at production sizes.
    feat = jnp.transpose(feat_nchw, (0, 2, 3, 1)).reshape(P, Cin)
    feat = jnp.pad(feat.astype(jnp.float32),
                   ((0, P_p - P), (0, Cin_p - Cin))).astype(jnp.bfloat16)

    w = jnp.pad(w_proj.astype(jnp.float32),
                ((0, Cin_p - Cin), (0, D_p - D))).astype(jnp.bfloat16)
    b = jnp.pad(b_proj.astype(jnp.float32), (0, D_p - D)).reshape(1, D_p)

    # Grid-invariant text work hoisted out of the kernel: normalize once, fold
    # in the clamped logit scale, pre-transpose to (D, N), pad, cast to bf16.
    t = text_features.astype(jnp.float32)
    t = t / jnp.maximum(jnp.linalg.norm(t, axis=-1, keepdims=True), 1e-12)
    scale = jnp.minimum(jnp.exp(logit_scale_param.astype(jnp.float32)), 100.0)
    tT = jnp.pad((scale * t).T, ((0, D_p - D), (0, N_p - N))).astype(jnp.bfloat16)

    anchors = jnp.pad(anchor_points.astype(jnp.float32),
                      (0, N_p - N)).reshape(1, N_p)
    bin_mask = jnp.pad(jnp.zeros((N,), jnp.float32), (0, N_p - N),
                       constant_values=-1e30).reshape(1, N_p)

    grid = (P_p // tile_p,)
    grid_spec = pltpu.PrefetchScalarGridSpec(
        num_scalar_prefetch=0,
        grid=grid,
        in_specs=[
            pl.BlockSpec((tile_p, Cin_p), lambda i: (i, 0)),   # feat tile
            pl.BlockSpec((Cin_p, D_p), lambda i: (0, 0)),      # w_proj
            pl.BlockSpec((1, D_p), lambda i: (0, 0)),          # b_proj
            pl.BlockSpec((D_p, N_p), lambda i: (0, 0)),        # scaled text^T
            pl.BlockSpec((1, N_p), lambda i: (0, 0)),          # anchors
            pl.BlockSpec((1, N_p), lambda i: (0, 0)),          # bin mask
        ],
        out_specs=pl.BlockSpec((tile_p, N_p), lambda i: (i, 0)),
    )

    out_flat = pl.pallas_call(
        functools.partial(gigacount_kernel, n_col=N),
        grid_spec=grid_spec,
        out_shape=jax.ShapeDtypeStruct((P_p, N_p), jnp.float32),
        compiler_params=pltpu.CompilerParams(
            dimension_semantics=("parallel",)),
    )(feat, w, b, tT, anchors, bin_mask)

    # Unpack: real-bin logits + packed expected column; back to NCHW convention.
    out = out_flat[:P]
    logits = jnp.transpose(out[:, :N].reshape(B, H, W, N), (0, 3, 1, 2))
    expected = jnp.transpose(out[:, N:N + 1].reshape(B, H, W, 1), (0, 3, 1, 2))
    return logits, expected


# ----------------------------------------------------------------------------
# Pure-JAX f32 reference (mirrors the PyTorch forward tail) for validation
# ----------------------------------------------------------------------------
def gigacount_head_ref(feat_nchw, w_proj, b_proj, text_features, anchor_points,
                       logit_scale_param):
    B, Cin, H, W = feat_nchw.shape
    N, D = text_features.shape
    x = jnp.transpose(feat_nchw, (0, 2, 3, 1))                 # (B,H,W,Cin)
    x = jnp.einsum("bhwc,cd->bhwd", x, w_proj) + b_proj        # 1x1 conv
    x = x / jnp.maximum(jnp.linalg.norm(x, axis=-1, keepdims=True), 1e-6)
    t = text_features / jnp.maximum(
        jnp.linalg.norm(text_features, axis=-1, keepdims=True), 1e-12)
    scale = jnp.minimum(jnp.exp(logit_scale_param), 100.0)
    logits = scale * jnp.einsum("bhwd,nd->bhwn", x, t)
    logits = jnp.transpose(logits, (0, 3, 1, 2))               # (B,N,H,W)
    probs = jax.nn.softmax(logits, axis=1)
    expected = jnp.sum(probs * anchor_points.reshape(1, N, 1, 1),
                       axis=1, keepdims=True)
    return logits, expected


# ----------------------------------------------------------------------------
# Main
# ----------------------------------------------------------------------------
if __name__ == "__main__":
    # Small shapes consistent with the module's forward:
    #   fused feature map (B, channels, H, W) -> 1x1 proj to output_dim
    #   text features (n_bins, output_dim), anchor_points (n_bins,)
    B, Cin, H, W = 2, 32, 16, 16        # (original: Cin=672, H=W=56)
    D = 128                             # output_dim (original: 1024)
    N_BINS = 8

    key = jax.random.PRNGKey(0)
    k_feat, k_w, k_b, k_txt = jax.random.split(key, 4)

    feat = jax.random.normal(k_feat, (B, Cin, H, W), dtype=jnp.float32)
    # deterministic "projection" conv params (1x1 conv == dense over channels)
    w_proj = jax.random.normal(k_w, (Cin, D), dtype=jnp.float32) / math.sqrt(Cin)
    b_proj = jax.random.normal(k_b, (D,), dtype=jnp.float32) * 0.01
    # synthetic text-encoder output for N_BINS prompts
    text_features = jax.random.normal(k_txt, (N_BINS, D), dtype=jnp.float32)
    # anchor points per bin
    anchor_points = jnp.arange(N_BINS, dtype=jnp.float32) * 2.0 + 0.5
    # logit_scale init: log(1/0.07)
    logit_scale = jnp.array(math.log(1.0 / 0.07), dtype=jnp.float32)

    logits, expected = gigacount_head(feat, w_proj, b_proj, text_features,
                                      anchor_points, logit_scale)
    jax.block_until_ready((logits, expected))

    # sanity check against pure-JAX f32 reference (kernel feeds the MXU bf16 and
    # uses an approximate EUP reciprocal, so tolerances are bf16-appropriate)
    logits_ref, expected_ref = gigacount_head_ref(
        feat, w_proj, b_proj, text_features, anchor_points, logit_scale)
    assert logits.shape == (B, N_BINS, H, W)
    assert expected.shape == (B, 1, H, W)
    assert not bool(jnp.any(jnp.isnan(logits)))
    assert not bool(jnp.any(jnp.isnan(expected)))
    assert jnp.allclose(logits, logits_ref, atol=1e-1, rtol=2e-2)
    assert jnp.allclose(expected, expected_ref, atol=2e-1, rtol=5e-2)

    print("KERNEL_OK")
</pallas_src>

<mosaic_0001>
module attributes {stable_mosaic.version = 11 : i64} {
  func.func @gigacount_kernel(%arg0: i32, %arg1: memref<256x128xbf16, #tpu.memory_space<vmem>>, %arg2: memref<128x128xbf16, #tpu.memory_space<vmem>>, %arg3: memref<1x128xf32, #tpu.memory_space<vmem>>, %arg4: memref<128x128xbf16, #tpu.memory_space<vmem>>, %arg5: memref<1x128xf32, #tpu.memory_space<vmem>>, %arg6: memref<1x128xf32, #tpu.memory_space<vmem>>, %arg7: memref<256x128xf32, #tpu.memory_space<vmem>>) attributes {dimension_semantics = [#tpu.dimension_semantics<parallel>], iteration_bounds = array<i64: 2>, scalar_prefetch = 0 : i64, scratch_operands = 0 : i64, tpu.core_type = #tpu.core_type<tc>, window_params = [{transform_indices = @transform_0, window_bounds = array<i64: 256, 128>}, {pipeline_mode = #tpu.pipeline_mode<synchronous>, transform_indices = @transform_1, window_bounds = array<i64: 128, 128>}, {pipeline_mode = #tpu.pipeline_mode<synchronous>, transform_indices = @transform_2, window_bounds = array<i64: 1, 128>}, {pipeline_mode = #tpu.pipeline_mode<synchronous>, transform_indices = @transform_3, window_bounds = array<i64: 128, 128>}, {pipeline_mode = #tpu.pipeline_mode<synchronous>, transform_indices = @transform_4, window_bounds = array<i64: 1, 128>}, {pipeline_mode = #tpu.pipeline_mode<synchronous>, transform_indices = @transform_5, window_bounds = array<i64: 1, 128>}, {transform_indices = @transform_6, window_bounds = array<i64: 256, 128>}]} {
    %c0 = arith.constant 0 : index
    %c0_0 = arith.constant 0 : index
    %0 = vector.load %arg1[%c0, %c0_0] : memref<256x128xbf16, #tpu.memory_space<vmem>>, vector<256x128xbf16>
    %c0_1 = arith.constant 0 : index
    %c0_2 = arith.constant 0 : index
    %1 = vector.load %arg2[%c0_1, %c0_2] : memref<128x128xbf16, #tpu.memory_space<vmem>>, vector<128x128xbf16>
    %cst = arith.constant dense<0.000000e+00> : vector<256x128xf32>
    %2 = tpu.matmul %0, %1, %cst {dimension_numbers = #tpu.dot_dimension_numbers<[1], [0], [0], [1], [0, 0, 1, 1], [], []>} : vector<256x128xbf16>, vector<128x128xbf16>, vector<256x128xf32> -> vector<256x128xf32>
    %c0_3 = arith.constant 0 : index
    %c0_4 = arith.constant 0 : index
    %3 = vector.load %arg3[%c0_3, %c0_4] : memref<1x128xf32, #tpu.memory_space<vmem>>, vector<1x128xf32>
    %4 = vector.broadcast %3 : vector<1x128xf32> to vector<256x128xf32>
    %5 = arith.addf %2, %4 : vector<256x128xf32>
    %6 = arith.mulf %5, %5 : vector<256x128xf32>
    %cst_5 = arith.constant dense<0.000000e+00> : vector<256xf32>
    %7 = vector.multi_reduction <add>, %6, %cst_5 [1] : vector<256x128xf32> to vector<256xf32>
    %8 = vector.shape_cast %7 : vector<256xf32> to vector<256x1xf32>
    %cst_6 = arith.constant 9.99999996E-13 : f32
    %9 = vector.broadcast %cst_6 : f32 to vector<256x1xf32>
    %10 = arith.maximumf %8, %9 : vector<256x1xf32>
    %11 = math.rsqrt %10 : vector<256x1xf32>
    %12 = vector.broadcast %11 : vector<256x1xf32> to vector<256x128xf32>
    %13 = arith.mulf %5, %12 : vector<256x128xf32>
    %14 = arith.truncf %13 : vector<256x128xf32> to vector<256x128xbf16>
    %c0_7 = arith.constant 0 : index
    %c0_8 = arith.constant 0 : index
    %15 = vector.load %arg4[%c0_7, %c0_8] : memref<128x128xbf16, #tpu.memory_space<vmem>>, vector<128x128xbf16>
    %cst_9 = arith.constant dense<0.000000e+00> : vector<256x128xf32>
    %16 = tpu.matmul %14, %15, %cst_9 {dimension_numbers = #tpu.dot_dimension_numbers<[1], [0], [0], [1], [0, 0, 1, 1], [], []>} : vector<256x128xbf16>, vector<128x128xbf16>, vector<256x128xf32> -> vector<256x128xf32>
    %c0_10 = arith.constant 0 : index
    %c0_11 = arith.constant 0 : index
    %17 = vector.load %arg6[%c0_10, %c0_11] : memref<1x128xf32, #tpu.memory_space<vmem>>, vector<1x128xf32>
    %18 = vector.broadcast %17 : vector<1x128xf32> to vector<256x128xf32>
    %19 = arith.addf %16, %18 : vector<256x128xf32>
    %cst_12 = arith.constant dense<0xFF800000> : vector<256xf32>
    %20 = vector.multi_reduction <maximumf>, %19, %cst_12 [1] : vector<256x128xf32> to vector<256xf32>
    %21 = vector.shape_cast %20 : vector<256xf32> to vector<256x1xf32>
    %22 = vector.broadcast %21 : vector<256x1xf32> to vector<256x128xf32>
    %23 = arith.subf %19, %22 : vector<256x128xf32>
    %24 = math.exp %23 : vector<256x128xf32>
    %cst_13 = arith.constant dense<0.000000e+00> : vector<256xf32>
    %25 = vector.multi_reduction <add>, %24, %cst_13 [1] : vector<256x128xf32> to vector<256xf32>
    %26 = vector.shape_cast %25 : vector<256xf32> to vector<256x1xf32>
    %27 = tpu.reciprocal %26 {approx = true} : vector<256x1xf32> -> vector<256x1xf32>
    %28 = vector.broadcast %27 : vector<256x1xf32> to vector<256x128xf32>
    %29 = arith.mulf %24, %28 : vector<256x128xf32>
    %c0_14 = arith.constant 0 : index
    %c0_15 = arith.constant 0 : index
    %30 = vector.load %arg5[%c0_14, %c0_15] : memref<1x128xf32, #tpu.memory_space<vmem>>, vector<1x128xf32>
    %31 = vector.broadcast %30 : vector<1x128xf32> to vector<256x128xf32>
    %32 = arith.mulf %29, %31 : vector<256x128xf32>
    %cst_16 = arith.constant dense<0.000000e+00> : vector<256xf32>
    %33 = vector.multi_reduction <add>, %32, %cst_16 [1] : vector<256x128xf32> to vector<256xf32>
    %34 = vector.shape_cast %33 : vector<256xf32> to vector<256x1xf32>
    %35 = tpu.iota {dimensions = array<i32: 1>} : vector<256x128xi32>
    %c8_i32 = arith.constant 8 : i32
    %36 = vector.broadcast %c8_i32 : i32 to vector<256x128xi32>
    %37 = arith.cmpi eq, %35, %36 : vector<256x128xi32>
    %38 = vector.shape_cast %34 : vector<256x1xf32> to vector<256x1xf32>
    %39 = vector.broadcast %38 : vector<256x1xf32> to vector<256x128xf32>
    %40 = arith.select %37, %39, %19 : vector<256x128xi1>, vector<256x128xf32>
    %c0_17 = arith.constant 0 : index
    %c0_18 = arith.constant 0 : index
    %41 = vector.load %arg7[%c0_17, %c0_18] : memref<256x128xf32, #tpu.memory_space<vmem>>, vector<256x128xf32>
    tpu.vector_store %arg7[%c0_17, %c0_18], %40 {strides = array<i32>} : memref<256x128xf32, #tpu.memory_space<vmem>>, vector<256x128xf32>,
    return
  }
  func.func @transform_0(%arg0: i32) -> (i32, i32) {
    %c0_i32 = arith.constant 0 : i32
    %c0_i32_0 = arith.constant 0 : i32
    return %arg0, %c0_i32 : i32, i32
  }
  func.func @transform_1(%arg0: i32) -> (i32, i32) {
    %c0_i32 = arith.constant 0 : i32
    %c0_i32_0 = arith.constant 0 : i32
    %c0_i32_1 = arith.constant 0 : i32
    return %c0_i32, %c0_i32_0 : i32, i32
  }
  func.func @transform_2(%arg0: i32) -> (i32, i32) {
    %c0_i32 = arith.constant 0 : i32
    %c0_i32_0 = arith.constant 0 : i32
    %c0_i32_1 = arith.constant 0 : i32
    return %c0_i32, %c0_i32_0 : i32, i32
  }
  func.func @transform_3(%arg0: i32) -> (i32, i32) {
    %c0_i32 = arith.constant 0 : i32
    %c0_i32_0 = arith.constant 0 : i32
    %c0_i32_1 = arith.constant 0 : i32
    return %c0_i32, %c0_i32_0 : i32, i32
  }
  func.func @transform_4(%arg0: i32) -> (i32, i32) {
    %c0_i32 = arith.constant 0 : i32
    %c0_i32_0 = arith.constant 0 : i32
    %c0_i32_1 = arith.constant 0 : i32
    return %c0_i32, %c0_i32_0 : i32, i32
  }
  func.func @transform_5(%arg0: i32) -> (i32, i32) {
    %c0_i32 = arith.constant 0 : i32
    %c0_i32_0 = arith.constant 0 : i32
    %c0_i32_1 = arith.constant 0 : i32
    return %c0_i32, %c0_i32_0 : i32, i32
  }
  func.func @transform_6(%arg0: i32) -> (i32, i32) {
    %c0_i32 = arith.constant 0 : i32
    %c0_i32_0 = arith.constant 0 : i32
    return %arg0, %c0_i32 : i32, i32
  }
}

</mosaic_0001>

<bundles_post_ra>
// kernel: gigacount_head.1
= control target key start
LH: loop header
LB: loop body
LE: loop exit
PB: predicated region body
PF: predicated region fallthrough
CT: control target
= control target key end

     0   :  { %s2137_s21 = smov 0   ;;  %s3200_s0 = inlined_call_operand.vmem [shape: bf16[512,128], index: 0, kind: input, shape index: {}]   ;;  %s3201_s1 = inlined_call_operand.vmem [shape: bf16[128,128], index: 1, kind: input, shape index: {}]   ;;  %s3202_s2 = inlined_call_operand.vmem [shape: f32[1,128], index: 2, kind: input, shape index: {}]   ;;  %s3203_s3 = inlined_call_operand.vmem [shape: bf16[128,128], index: 3, kind: input, shape index: {}]   ;;  %s3204_s4 = inlined_call_operand.vmem [shape: f32[1,128], index: 4, kind: input, shape index: {}]   ;;  %s3205_s5 = inlined_call_operand.vmem [shape: f32[1,128], index: 5, kind: input, shape index: {}]   ;;  %s3206_s6 = inlined_call_operand.vmem [shape: f32[512,128], index: 6, kind: output, shape index: {}]  }
   0x1 LB: > { %s1704_s22 = sadd.s32 4294967295, %s2100_s21   ;;  %p1708_p0 = scmp.ge.s32.totalorder %s2100_s21, 1  ;;  %s2100_s21 = sphi %s2137_s21, %s16_s21  }
   0x2   : > { %p213_p1 = scmp.lt.s32.totalorder %s2100_s21, 3 }
   0x4   : > { %p214_p2 = pnand %p1708_p0, %p213_p1 }
   0x6   : > { %217 = sbr.rel (%p214_p2) target bundleno = 956 (0x3bc), region = 44 }
   0xb   : > { %v1866_v0 = vld [vmem:[%s3201_s1 + $0x38] sm:$0xff]  ;;  %v1865_v1 = vld [vmem:[%s3201_s1 + $0x30] sm:$0xff]  ;;  %v1864_v2 = vld [vmem:[%s3201_s1 + $0x28] sm:$0xff]  ;;  %s1709_s7 = sshll.u32 %s1704_s22, 5 }
   0xc   : > { %451 = vmatpush.bf16.msra.mxu0 %v1866_v0  ;;  %1875 = vmatpush.bf16.msra.mxu2 %v1866_v0  ;;  %v1863_v3 = vld [vmem:[%s3201_s1 + $0x20] sm:$0xff]  ;;  %v1862_v4 = vld [vmem:[%s3201_s1 + $0x18] sm:$0xff]  ;;  %p244_p3 = scmp.lt.s32.totalorder %s1709_s7, 63  ;;  %v1861_v5 = vld [vmem:[%s3201_s1 + $0x10] sm:$0xff] }
   0xd   : > { %v1860_v6 = vld [vmem:[%s3201_s1 + $0x8] sm:$0xff]  ;;  %v1859_v7 = vld [vmem:[%s3201_s1] sm:$0xff] }
   0xe   : > { %s3274_s7 = smov (!%p244_p3, %s1709_s7), 63  ;;  %v2196_v24 = vld [vmem:[%s3202_s2] ss:$0 sm:$0xff] }
   0xf   : > { %s1710_s14 = sshll.u32 %s3274_s7, 2  ;;  %s1712_s20 = sshll.u32 %s3274_s7, 3 }
  0x10   : > { %452 = vmatpush.bf16.msra.mxu0 %v1865_v1  ;;  %1876 = vmatpush.bf16.msra.mxu2 %v1865_v1  ;;  %s2175_s19 = scalar_lea.vmem %s3200_s0, %s1710_s14  ;;  %s3059_s24 = scalar_lea.vmem %s3206_s6, %s1712_s20 }
  0x11   : > { %v1843_v8 = vld [vmem:[%s2175_s19] sm:$0xff]  ;;  %v1844_v10 = vld [vmem:[%s2175_s19 + $0x8] sm:$0xff]  ;;  %v1845_v12 = vld [vmem:[%s2175_s19 + $0x10] sm:$0xff] }
  0x12   : > { %v1851_v9 = vld [vmem:[%s2175_s19 + $0x40] sm:$0xff]  ;;  %v1852_v11 = vld [vmem:[%s2175_s19 + $0x48] sm:$0xff]  ;;  %v1853_v13 = vld [vmem:[%s2175_s19 + $0x50] sm:$0xff] }
  0x13   : > { %v1846_v14 = vld [vmem:[%s2175_s19 + $0x18] sm:$0xff]  ;;  %v1847_v16 = vld [vmem:[%s2175_s19 + $0x20] sm:$0xff]  ;;  %v1848_v18 = vld [vmem:[%s2175_s19 + $0x28] sm:$0xff] }
  0x14   : > { %453 = vmatpush.bf16.msra.mxu0 %v1864_v2  ;;  %1877 = vmatpush.bf16.msra.mxu2 %v1864_v2  ;;  %v1854_v15 = vld [vmem:[%s2175_s19 + $0x58] sm:$0xff]  ;;  %v1855_v17 = vld [vmem:[%s2175_s19 + $0x60] sm:$0xff]  ;;  %v1856_v19 = vld [vmem:[%s2175_s19 + $0x68] sm:$0xff] }
  0x15   : > { %v1849_v20 = vld [vmem:[%s2175_s19 + $0x30] sm:$0xff]  ;;  %v1850_v22 = vld [vmem:[%s2175_s19 + $0x38] sm:$0xff] }
  0x16   : > { %v1857_v21 = vld [vmem:[%s2175_s19 + $0x70] sm:$0xff]  ;;  %v1858_v23 = vld [vmem:[%s2175_s19 + $0x78] sm:$0xff] }
  0x18   : > { %454 = vmatpush.bf16.msra.mxu0 %v1863_v3  ;;  %1878 = vmatpush.bf16.msra.mxu2 %v1863_v3 }
  0x1c   : > { %455 = vmatpush.bf16.msra.mxu0 %v1862_v4  ;;  %1879 = vmatpush.bf16.msra.mxu2 %v1862_v4 }
  0x20   : > { %456 = vmatpush.bf16.msra.mxu0 %v1861_v5  ;;  %1880 = vmatpush.bf16.msra.mxu2 %v1861_v5 }
  0x24   : > { %457 = vmatpush.bf16.msra.mxu0 %v1860_v6  ;;  %1881 = vmatpush.bf16.msra.mxu2 %v1860_v6 }
  0x28   : > { %458 = vmatpush.bf16.msra.mxu0 %v1859_v7  ;;  %1882 = vmatpush.bf16.msra.mxu2 %v1859_v7 }
  0x2b   : > { %459 = vmatmul.bf16.vlgmr.msra.gmra.mxu0 %v1843_v8  ;;  %499 = vmatmul.bf16.vlgmr.msra.gmra.mxu2 %v1851_v9 }
  0x3b   : > { %464 = vmatmul.bf16.gmra.mxu0 %v1844_v10  ;;  %504 = vmatmul.bf16.gmra.mxu2 %v1852_v11 }
  0x4b   : > { %469 = vmatmul.bf16.gmra.mxu0 %v1845_v12  ;;  %509 = vmatmul.bf16.gmra.mxu2 %v1853_v13 }
  0x5b   : > { %474 = vmatmul.bf16.gmra.mxu0 %v1846_v14  ;;  %514 = vmatmul.bf16.gmra.mxu2 %v1854_v15 }
  0x6b   : > { %479 = vmatmul.bf16.gmra.mxu0 %v1847_v16  ;;  %519 = vmatmul.bf16.gmra.mxu2 %v1855_v17 }
  0x7b   : > { %484 = vmatmul.bf16.gmra.mxu0 %v1848_v18  ;;  %524 = vmatmul.bf16.gmra.mxu2 %v1856_v19 }
  0x8b   : > { %489 = vmatmul.bf16.gmra.mxu0 %v1849_v20  ;;  %529 = vmatmul.bf16.gmra.mxu2 %v1857_v21 }
  0x9b   : > { %494 = vmatmul.bf16.gmra.mxu0 %v1850_v22  ;;  %534 = vmatmul.bf16.gmra.mxu2 %v1858_v23 }
  0xa8   : > { %v460_v25 = vpop.f32.mrf.mxu0 }
  0xa9   : > { %v2199_v26 = vadd.f32 %v2196_v24, %v460_v25 }
  0xab   : > { %v540_v27 = vmul.f32 %v2199_v26, %v2199_v26 }
  0xad   : > { %572 = vadd.xlane.f32.xlu1 %v540_v27 }
  0xae   : > { %v500_v28 = vpop.f32.mrf.mxu2 }
  0xaf   : > { %v2204_v29 = vadd.f32 %v2196_v24, %v500_v28 }
  0xb0   : > { %v462_v30 = vpop.f32.mrf.mxu0 }
  0xb1   : > { %v2207_v31 = vadd.f32 %v2196_v24, %v462_v30  ;;  %v556_v32 = vmul.f32 %v2204_v29, %v2204_v29  ;;  %v1874_v30 = vld [vmem:[%s3203_s3 + $0x38] sm:$0xff] }
  0xb2   : > { %1104 = vmatpush.bf16.msra.mxu1 %v1874_v30  ;;  %1883 = vmatpush.bf16.msra.mxu3 %v1874_v30 }
  0xb3   : > { %604 = vadd.xlane.f32.xlu0 %v556_v32  ;;  %v541_v33 = vmul.f32 %v2207_v31, %v2207_v31 }
  0xb5   : > { %574 = vadd.xlane.f32.xlu1 %v541_v33  ;;  %v1873_v33 = vld [vmem:[%s3203_s3 + $0x30] sm:$0xff] }
  0xb6   : > { %v502_v34 = vpop.f32.mrf.mxu2  ;;  %1105 = vmatpush.bf16.msra.mxu1 %v1873_v33  ;;  %1884 = vmatpush.bf16.msra.mxu3 %v1873_v33 }
  0xb7   : > { %v2214_v35 = vadd.f32 %v2196_v24, %v502_v34 }
  0xb8   : > { %v465_v36 = vpop.f32.mrf.mxu0 }
  0xb9   : > { %v557_v37 = vmul.f32 %v2214_v35, %v2214_v35  ;;  %v2219_v38 = vadd.f32 %v2196_v24, %v465_v36 }
  0xbb   : > { %606 = vadd.xlane.f32.xlu0 %v557_v37  ;;  %v542_v41 = vmul.f32 %v2219_v38, %v2219_v38 }
  0xbe   : > { %v505_v39 = vpop.f32.mrf.mxu2 }
  0xbf   : > { %v2222_v40 = vadd.f32 %v2196_v24, %v505_v39 }
  0xc0   : > { %v467_v42 = vpop.f32.mrf.mxu0 }
  0xc1   : > { %v2227_v43 = vadd.f32 %v2196_v24, %v467_v42  ;;  %v558_v44 = vmul.f32 %v2222_v40, %v2222_v40 }
  0xc3   : > { %608 = vadd.xlane.f32.xlu2 %v558_v44  ;;  %576 = vadd.xlane.f32.xlu0 %v542_v41  ;;  %v543_v45 = vmul.f32 %v2227_v43, %v2227_v43  ;;  %v1872_v41 = vld [vmem:[%s3203_s3 + $0x28] sm:$0xff] }
  0xc4   : > { %1106 = vmatpush.bf16.msra.mxu1 %v1872_v41  ;;  %1885 = vmatpush.bf16.msra.mxu3 %v1872_v41 }
  0xc5   : > { %578 = vadd.xlane.f32.xlu1 %v543_v45 }
  0xc6   : > { %v507_v46 = vpop.f32.mrf.mxu2 }
  0xc7   : > { %v2234_v47 = vadd.f32 %v2196_v24, %v507_v46  ;;  %v1871_v46 = vld [vmem:[%s3203_s3 + $0x20] sm:$0xff] }
  0xc8   : > { %v470_v48 = vpop.f32.mrf.mxu0  ;;  %1107 = vmatpush.bf16.msra.mxu1 %v1871_v46  ;;  %1886 = vmatpush.bf16.msra.mxu3 %v1871_v46 }
  0xc9   : > { %v2237_v49 = vadd.f32 %v2196_v24, %v470_v48  ;;  %v559_v50 = vmul.f32 %v2234_v47, %v2234_v47 }
  0xcb   : > { %610 = vadd.xlane.f32.xlu2 %v559_v50  ;;  %v544_v51 = vmul.f32 %v2237_v49, %v2237_v49 }
  0xcd   : > { %580 = vadd.xlane.f32.xlu1 %v544_v51 }
  0xce   : > { %v510_v52 = vpop.f32.mrf.mxu2 }
  0xcf   : > { %v2244_v53 = vadd.f32 %v2196_v24, %v510_v52 }
  0xd0   : > { %v472_v54 = vpop.f32.mrf.mxu0 }
  0xd1   : > { %v560_v55 = vmul.f32 %v2244_v53, %v2244_v53  ;;  %v2249_v56 = vadd.f32 %v2196_v24, %v472_v54  ;;  %v1870_v54 = vld [vmem:[%s3203_s3 + $0x18] sm:$0xff] }
  0xd2   : > { %1108 = vmatpush.bf16.msra.mxu1 %v1870_v54  ;;  %1887 = vmatpush.bf16.msra.mxu3 %v1870_v54 }
  0xd3   : > { %612 = vadd.xlane.f32.xlu2 %v560_v55  ;;  %v545_v60 = vmul.f32 %v2249_v56, %v2249_v56 }
  0xd6   : > { %v512_v57 = vpop.f32.mrf.mxu2 }
  0xd7   : > { %v2252_v58 = vadd.f32 %v2196_v24, %v512_v57  ;;  %v1869_v57 = vld [vmem:[%s3203_s3 + $0x10] sm:$0xff] }
  0xd8   : > { %v475_v59 = vpop.f32.mrf.mxu0  ;;  %1109 = vmatpush.bf16.msra.mxu1 %v1869_v57  ;;  %1888 = vmatpush.bf16.msra.mxu3 %v1869_v57 }
  0xd9   : > { %v561_v61 = vmul.f32 %v2252_v58, %v2252_v58  ;;  %v2259_v62 = vadd.f32 %v2196_v24, %v475_v59 }
  0xdb   : > { %582 = vadd.xlane.f32.xlu2 %v545_v60  ;;  %614 = vadd.xlane.f32.xlu0 %v561_v61  ;;  %v546_v1 = vmul.f32 %v2259_v62, %v2259_v62 }
  0xde   : > { %v515_v63 = vpop.f32.mrf.mxu2 }
  0xdf   : > { %v2262_v0 = vadd.f32 %v2196_v24, %v515_v63 }
  0xe0   : > { %v477_v2 = vpop.f32.mrf.mxu0 }
  0xe1   : > { %v562_v3 = vmul.f32 %v2262_v0, %v2262_v0  ;;  %v2269_v4 = vadd.f32 %v2196_v24, %v477_v2 }
  0xe3   : > { %584 = vadd.xlane.f32.xlu2 %v546_v1  ;;  %616 = vadd.xlane.f32.xlu0 %v562_v3  ;;  %v547_v8 = vmul.f32 %v2269_v4, %v2269_v4  ;;  %v1868_v3 = vld [vmem:[%s3203_s3 + $0x8] sm:$0xff] }
  0xe4   : > { %1110 = vmatpush.bf16.msra.mxu1 %v1868_v3  ;;  %1889 = vmatpush.bf16.msra.mxu3 %v1868_v3 }
  0xe6   : > { %v517_v5 = vpop.f32.mrf.mxu2 }
  0xe7   : > { %v2272_v6 = vadd.f32 %v2196_v24, %v517_v5 }
  0xe8   : > { %v480_v7 = vpop.f32.mrf.mxu0 }
  0xe9   : > { %v563_v9 = vmul.f32 %v2272_v6, %v2272_v6  ;;  %v2279_v10 = vadd.f32 %v2196_v24, %v480_v7  ;;  %v1867_v7 = vld [vmem:[%s3203_s3] sm:$0xff] }
  0xea   : > { %1111 = vmatpush.bf16.msra.mxu1 %v1867_v7  ;;  %1890 = vmatpush.bf16.msra.mxu3 %v1867_v7 }
  0xeb   : > { %586 = vadd.xlane.f32.xlu0 %v547_v8  ;;  %618 = vadd.xlane.f32.xlu1 %v563_v9  ;;  %v548_v13 = vmul.f32 %v2279_v10, %v2279_v10 }
  0xee   : > { %v520_v11 = vpop.f32.mrf.mxu2 }
  0xef   : > { %v2282_v12 = vadd.f32 %v2196_v24, %v520_v11 }
  0xf0   : > { %v482_v14 = vpop.f32.mrf.mxu0 }
  0xf1   : > { %v564_v15 = vmul.f32 %v2282_v12, %v2282_v12  ;;  %v2289_v16 = vadd.f32 %v2196_v24, %v482_v14 }
  0xf3   : > { %588 = vadd.xlane.f32.xlu0 %v548_v13  ;;  %620 = vadd.xlane.f32.xlu1 %v564_v15  ;;  %v549_v21 = vmul.f32 %v2289_v16, %v2289_v16 }
  0xf6   : > { %v522_v17 = vpop.f32.mrf.mxu2 }
  0xf7   : > { %v2292_v18 = vadd.f32 %v2196_v24, %v522_v17 }
  0xf8   : > { %v485_v19 = vpop.f32.mrf.mxu0 }
  0xf9   : > { %v565_v20 = vmul.f32 %v2292_v18, %v2292_v18  ;;  %v2299_v22 = vadd.f32 %v2196_v24, %v485_v19 }
  0xfb   : > { %622 = vadd.xlane.f32.xlu2 %v565_v20  ;;  %590 = vadd.xlane.f32.xlu1 %v549_v21  ;;  %v550_v27 = vmul.f32 %v2299_v22, %v2299_v22 }
  0xfe   : > { %v525_v23 = vpop.f32.mrf.mxu2 }
  0xff   : > { %v2302_v25 = vadd.f32 %v2196_v24, %v525_v23 }
 0x100   : > { %v487_v28 = vpop.f32.mrf.mxu0 }
 0x101   : > { %v566_v32 = vmul.f32 %v2302_v25, %v2302_v25  ;;  %v2315_v34 = vadd.f32 %v2196_v24, %v487_v28 }
 0x103   : > { %624 = vadd.xlane.f32.xlu2 %v566_v32  ;;  %592 = vadd.xlane.f32.xlu1 %v550_v27  ;;  %v551_v42 = vmul.f32 %v2315_v34, %v2315_v34 }
 0x106   : > { %v527_v36 = vpop.f32.mrf.mxu2 }
 0x107   : > { %v2318_v37 = vadd.f32 %v2196_v24, %v527_v36 }
 0x108   : > { %v490_v39 = vpop.f32.mrf.mxu0 }
 0x109   : > { %v567_v44 = vmul.f32 %v2318_v37, %v2318_v37  ;;  %v2328_v45 = vadd.f32 %v2196_v24, %v490_v39 }
 0x10b   : > { %594 = vadd.xlane.f32.xlu2 %v551_v42  ;;  %626 = vadd.xlane.f32.xlu0 %v567_v44  ;;  %v552_v51 = vmul.f32 %v2328_v45, %v2328_v45 }
 0x10e   : > { %v530_v48 = vpop.f32.mrf.mxu2 }
 0x10f   : > { %v2334_v50 = vadd.f32 %v2196_v24, %v530_v48 }
 0x110   : > { %v492_v52 = vpop.f32.mrf.mxu0 }
 0x111   : > { %v568_v55 = vmul.f32 %v2334_v50, %v2334_v50  ;;  %v2347_v59 = vadd.f32 %v2196_v24, %v492_v52 }
 0x113   : > { %596 = vadd.xlane.f32.xlu2 %v552_v51  ;;  %628 = vadd.xlane.f32.xlu0 %v568_v55  ;;  %v553_v1 = vmul.f32 %v2347_v59, %v2347_v59 }
 0x116   : > { %v532_v60 = vpop.f32.mrf.mxu2 }
 0x117   : > { %v2350_v61 = vadd.f32 %v2196_v24, %v532_v60 }
 0x118   : > { %v495_v63 = vpop.f32.mrf.mxu0 }
 0x119   : > { %v569_v2 = vmul.f32 %v2350_v61, %v2350_v61  ;;  %v2360_v5 = vadd.f32 %v2196_v24, %v495_v63 }
 0x11b   : > { %598 = vadd.xlane.f32.xlu0 %v553_v1  ;;  %630 = vadd.xlane.f32.xlu1 %v569_v2  ;;  %v554_v11 = vmul.f32 %v2360_v5, %v2360_v5 }
 0x11e   : > { %v535_v8 = vpop.f32.mrf.mxu2 }
 0x11f   : > { %v2366_v9 = vadd.f32 %v2196_v24, %v535_v8 }
 0x120   : > { %v573_v13 = vpop.xlane.xlu1 %572  ;;  %v497_v17 = vpop.f32.mrf.mxu0 }
 0x121   : > { %v636_v14 = vmax.f32 %v573_v13, 1e-12  ;;  %v570_v15 = vmul.f32 %v2366_v9, %v2366_v9  ;;  %v2373_v19 = vadd.f32 %v2196_v24, %v497_v17 }
 0x123   : > { %1902 = vrsqrt.f32 %v636_v14  ;;  %600 = vadd.xlane.f32.xlu0 %v554_v11  ;;  %632 = vadd.xlane.f32.xlu1 %v570_v15  ;;  %v555_v36 = vmul.f32 %v2373_v19, %v2373_v19  ;;  %vm674_vm0 = vweird.f32 %v636_v14 }
 0x126   : > { %v537_v20 = vpop.f32.mrf.mxu2  ;;  %v605_v21 = vpop.xlane.xlu0 %604 }
 0x127   : > { %v2376_v23 = vadd.f32 %v2196_v24, %v537_v20  ;;  %v2378_v27 = vmax.f32 %v605_v21, 1e-12 }
 0x128   : > { %v575_v28 = vpop.xlane.xlu1 %574 }
 0x129   : > { %v1903_v30 = vpop.eup %1902  ;;  %1904 = vrsqrt.f32 %v2378_v27  ;;  %v637_v32 = vmax.f32 %v575_v28, 1e-12  ;;  %v571_v33 = vmul.f32 %v2376_v23, %v2376_v23  ;;  %vm834_vm8 = vweird.f32 %v2378_v27 }
 0x12a   : > { %v669_v39 = vmul.f32 %v1903_v30, %v636_v14  ;;  %vm675_vm1 = vweird.f32 %v1903_v30 }
 0x12b   : > { %1906 = vrsqrt.f32 %v637_v32  ;;  %634 = vadd.xlane.f32.xlu2 %v571_v33  ;;  %602 = vadd.xlane.f32.xlu1 %v555_v36  ;;  %vm2394_vm2 = vmor %vm674_vm0, %vm675_vm1  ;;  %vm684_vm4 = vweird.f32 %v637_v32 }
 0x12c   : > { %v670_v41 = vmul.f32 %v1903_v30, %v669_v39 }
 0x12e   : > { %v671_v24 = vmul.f32 0.5, %v670_v41  ;;  %v607_v42 = vpop.xlane.xlu0 %606 }
 0x12f   : > { %v2385_v44 = vpop.eup %1904  ;;  %v653_v46 = vmax.f32 %v607_v42, 1e-12 }
 0x130   : > { %v829_v48 = vmul.f32 %v2385_v44, %v2378_v27  ;;  %v672_v52 = vsub.f32 1.5, %v671_v24  ;;  %vm835_vm6 = vweird.f32 %v2385_v44 }
 0x131   : > { %v1907_v51 = vpop.eup %1906  ;;  %1908 = vrsqrt.f32 %v653_v46  ;;  %vm2416_vm9 = vmor %vm834_vm8, %vm835_vm6  ;;  %vm844_vm10 = vweird.f32 %v653_v46 }
 0x132   : > { %v830_v54 = vmul.f32 %v2385_v44, %v829_v48  ;;  %v679_v55 = vmul.f32 %v1907_v51, %v637_v32  ;;  %v673_v60 = vmul.f32 %v1903_v30, %v672_v52  ;;  %vm685_vm3 = vweird.f32 %v1907_v51 }
 0x133   : > { %vm686_vm5 = vmor %vm684_vm4, %vm685_vm3 }
 0x134   : > { %v680_v57 = vmul.f32 %v1907_v51, %v679_v55  ;;  %v831_v63 = vmul.f32 0.5, %v830_v54  ;;  %v677_v21 = vsel %vm2394_vm2, %v1903_v30, %v673_v60 }
 0x135   : > { %v988_v24 = vmul.f32 %v677_v21, %v2199_v26 }
 0x136   : > { %v681_v1 = vmul.f32 0.5, %v680_v57  ;;  %v609_v2 = vpop.xlane.xlu2 %608  ;;  %v577_v3 = vpop.xlane.xlu0 %576  ;;  %v832_v28 = vsub.f32 1.5, %v831_v63 }
 0x137   : > { %v1909_v7 = vpop.eup %1908  ;;  %v2390_v8 = vmax.f32 %v609_v2, 1e-12  ;;  %v2392_v11 = vmax.f32 %v577_v3, 1e-12 }
 0x138   : > { %v682_v15 = vsub.f32 1.5, %v681_v1  ;;  %v839_v17 = vmul.f32 %v1909_v7, %v653_v46  ;;  %v579_v20 = vpop.xlane.xlu1 %578  ;;  %v833_v30 = vmul.f32 %v2385_v44, %v832_v28  ;;  %vm845_vm7 = vweird.f32 %v1909_v7 }
 0x139   : > { %1910 = vrsqrt.f32 %v2390_v8  ;;  %v2399_v14 = vmax.f32 %v579_v20, 1e-12  ;;  %vm846_vm11 = vmor %vm844_vm10, %vm845_vm7  ;;  %vm694_vm14 = vweird.f32 %v2392_v11  ;;  %vm854_vm3 = vweird.f32 %v2390_v8 }
 0x13a   : > { %v840_v33 = vmul.f32 %v1909_v7, %v839_v17  ;;  %1912 = vrsqrt.f32 %v2392_v11  ;;  %v683_v36 = vmul.f32 %v1907_v51, %v682_v15  ;;  %v837_v13 = vsel %vm2416_vm9, %v2385_v44, %v833_v30 }
 0x13b   : > { %1914 = vrsqrt.f32 %v2399_v14  ;;  %v1004_v28 = vmul.f32 %v837_v13, %v2204_v29  ;;  %vm704_vm0 = vweird.f32 %v2399_v14 }
 0x13c   : > { %v841_v39 = vmul.f32 0.5, %v840_v33  ;;  %v687_v41 = vsel %vm686_vm5, %v1907_v51, %v683_v36 }
 0x13d   : > { %v989_v32 = vmul.f32 %v687_v41, %v2207_v31 }
 0x13e   : > { %v842_v42 = vsub.f32 1.5, %v841_v39  ;;  %v611_v48 = vpop.xlane.xlu2 %610 }
 0x13f   : > { %v2409_v52 = vpop.eup %1910  ;;  %v2411_v54 = vmax.f32 %v611_v48, 1e-12  ;;  %v1020_v55 = vpack.c.bf16 %v989_v32, %v988_v24 }
 0x140   : > { %v1913_v57 = vpop.eup %1912  ;;  %v849_v26 = vmul.f32 %v2409_v52, %v2390_v8  ;;  %v581_v51 = vpop.xlane.xlu1 %580  ;;  %v843_v31 = vmul.f32 %v1909_v7, %v842_v42  ;;  %vm855_vm2 = vweird.f32 %v2409_v52 }
 0x141   : > { %v1915_v60 = vpop.eup %1914  ;;  %v689_v1 = vmul.f32 %v1913_v57, %v2392_v11  ;;  %1916 = vrsqrt.f32 %v2411_v54  ;;  %1112 = vmatmul.bf16.vlgmr.msra.gmra.mxu1 %v1020_v55  ;;  %v2424_v3 = vmax.f32 %v581_v51, 1e-12  ;;  %vm695_vm12 = vweird.f32 %v1913_v57  ;;  %vm856_vm5 = vmor %vm854_vm3, %vm855_vm2 }
 0x142   : > { %v850_v2 = vmul.f32 %v2409_v52, %v849_v26  ;;  %v699_v27 = vmul.f32 %v1915_v60, %v2399_v14  ;;  %v847_v17 = vsel %vm846_vm11, %v1909_v7, %v843_v31  ;;  %vm705_vm13 = vweird.f32 %v1915_v60  ;;  %vm696_vm15 = vmor %vm694_vm14, %vm695_vm12 }
 0x143   : > { %v690_v15 = vmul.f32 %v1913_v57, %v689_v1  ;;  %1918 = vrsqrt.f32 %v2424_v3  ;;  %v1005_v33 = vmul.f32 %v847_v17, %v2214_v35  ;;  %vm706_vm1 = vmor %vm704_vm0, %vm705_vm13  ;;  %vm864_vm6 = vweird.f32 %v2411_v54 }
 0x144   : > { %v851_v20 = vmul.f32 0.5, %v850_v2  ;;  %v700_v46 = vmul.f32 %v1915_v60, %v699_v27  ;;  %vm714_vm8 = vweird.f32 %v2424_v3 }
 0x145   : > { %v691_v21 = vmul.f32 0.5, %v690_v15  ;;  %v1028_v42 = vpack.c.bf16 %v1005_v33, %v1004_v28 }
 0x146   : > { %v701_v36 = vmul.f32 0.5, %v700_v46  ;;  %v613_v39 = vpop.xlane.xlu2 %612  ;;  %v852_v44 = vsub.f32 1.5, %v851_v20 }
 0x147   : > { %v1917_v41 = vpop.eup %1916  ;;  %v692_v24 = vsub.f32 1.5, %v691_v21  ;;  %v2432_v32 = vmax.f32 %v613_v39, 1e-12  ;;  %1152 = vmatmul.bf16.vlgmr.msra.gmra.mxu3 %v1028_v42 }
 0x148   : > { %v702_v48 = vsub.f32 1.5, %v701_v36  ;;  %v859_v7 = vmul.f32 %v1917_v41, %v2411_v54  ;;  %v853_v63 = vmul.f32 %v2409_v52, %v852_v44  ;;  %vm865_vm4 = vweird.f32 %v1917_v41 }
 0x149   : > { %1920 = vrsqrt.f32 %v2432_v32  ;;  %v693_v29 = vmul.f32 %v1913_v57, %v692_v24  ;;  %v2437_v35 = vpop.eup %1918  ;;  %vm866_vm7 = vmor %vm864_vm6, %vm865_vm4  ;;  %vm874_vm13 = vweird.f32 %v2432_v32 }
 0x14a   : > { %v860_v30 = vmul.f32 %v1917_v41, %v859_v7  ;;  %v703_v55 = vmul.f32 %v1915_v60, %v702_v48  ;;  %v709_v26 = vmul.f32 %v2437_v35, %v2424_v3  ;;  %vm715_vm9 = vweird.f32 %v2437_v35 }
 0x14b   : > { %v697_v51 = vsel %vm696_vm15, %v1913_v57, %v693_v29  ;;  %vm2470_vm10 = vmor %vm714_vm8, %vm715_vm9 }
 0x14c   : > { %v861_v31 = vmul.f32 0.5, %v860_v30  ;;  %v707_v11 = vsel %vm706_vm1, %v1915_v60, %v703_v55  ;;  %v990_v1 = vmul.f32 %v697_v51, %v2219_v38  ;;  %v710_v27 = vmul.f32 %v2437_v35, %v709_v26 }
 0x14d   : > { %v991_v2 = vmul.f32 %v707_v11, %v2227_v43  ;;  %v857_v43 = vsel %vm856_vm5, %v2409_v52, %v853_v63 }
 0x14e   : > { %v862_v14 = vsub.f32 1.5, %v861_v31  ;;  %v583_v13 = vpop.xlane.xlu2 %582  ;;  %v615_v15 = vpop.xlane.xlu0 %614  ;;  %v711_v46 = vmul.f32 0.5, %v710_v27  ;;  %v1006_v33 = vmul.f32 %v857_v43, %v2222_v40 }
 0x14f   : > { %v2448_v17 = vpop.eup %1920  ;;  %v641_v57 = vmax.f32 %v583_v13, 1e-12  ;;  %v2450_v20 = vmax.f32 %v615_v15, 1e-12  ;;  %v1021_v60 = vpack.c.bf16 %v991_v2, %v990_v1 }
 0x150   : > { %v869_v38 = vmul.f32 %v2448_v17, %v2432_v32  ;;  %v863_v8 = vmul.f32 %v1917_v41, %v862_v14  ;;  %v712_v39 = vsub.f32 1.5, %v711_v46  ;;  %vm875_vm11 = vweird.f32 %v2448_v17 }
 0x151   : > { %1922 = vrsqrt.f32 %v641_v57  ;;  %1117 = vmatmul.bf16.gmra.mxu1 %v1021_v60  ;;  %vm724_vm14 = vweird.f32 %v641_v57  ;;  %vm884_vm0 = vweird.f32 %v2450_v20  ;;  %vm2496_vm2 = vmor %vm874_vm13, %vm875_vm11 }
 0x152   : > { %1924 = vrsqrt.f32 %v2450_v20  ;;  %v867_v21 = vsel %vm866_vm7, %v1917_v41, %v863_v8  ;;  %v870_v28 = vmul.f32 %v2448_v17, %v869_v38 }
 0x153   : > { %v1007_v36 = vmul.f32 %v867_v21, %v2234_v47  ;;  %v713_v47 = vmul.f32 %v2437_v35, %v712_v39 }
 0x154   : > { %v871_v52 = vmul.f32 0.5, %v870_v28 }
 0x155   : > { %v1029_v54 = vpack.c.bf16 %v1007_v36, %v1006_v33  ;;  %v717_v2 = vsel %vm2470_vm10, %v2437_v35, %v713_v47 }
 0x156   : > { %v585_v24 = vpop.xlane.xlu2 %584  ;;  %v617_v42 = vpop.xlane.xlu0 %616  ;;  %v872_v55 = vsub.f32 1.5, %v871_v52  ;;  %v992_v21 = vmul.f32 %v717_v2, %v2237_v49 }
 0x157   : > { %v1923_v44 = vpop.eup %1922  ;;  %v2460_v48 = vmax.f32 %v585_v24, 1e-12  ;;  %v2462_v7 = vmax.f32 %v617_v42, 1e-12  ;;  %1157 = vmatmul.bf16.gmra.mxu3 %v1029_v54 }
 0x158   : > { %v1925_v29 = vpop.eup %1924  ;;  %v719_v30 = vmul.f32 %v1923_v44, %v641_v57  ;;  %vm725_vm12 = vweird.f32 %v1923_v44  ;;  %v873_v60 = vmul.f32 %v2448_v17, %v872_v55 }
 0x159   : > { %v879_v41 = vmul.f32 %v1925_v29, %v2450_v20  ;;  %1926 = vrsqrt.f32 %v2460_v48  ;;  %vm726_vm15 = vmor %vm724_vm14, %vm725_vm12  ;;  %vm885_vm1 = vweird.f32 %v1925_v29  ;;  %vm734_vm5 = vweird.f32 %v2460_v48 }
 0x15a   : > { %v720_v40 = vmul.f32 %v1923_v44, %v719_v30  ;;  %1928 = vrsqrt.f32 %v2462_v7  ;;  %v877_v33 = vsel %vm2496_vm2, %v2448_v17, %v873_v60  ;;  %vm886_vm3 = vmor %vm884_vm0, %vm885_vm1  ;;  %vm894_vm9 = vweird.f32 %v2462_v7 }
 0x15b   : > { %v880_v26 = vmul.f32 %v1925_v29, %v879_v41 }
 0x15c   : > { %v721_v51 = vmul.f32 0.5, %v720_v40 }
 0x15d   : > { %v881_v3 = vmul.f32 0.5, %v880_v26 }
 0x15e   : > { %v722_v11 = vsub.f32 1.5, %v721_v51  ;;  %v587_v63 = vpop.xlane.xlu0 %586  ;;  %v619_v1 = vpop.xlane.xlu1 %618 }
 0x15f   : > { %v2478_v14 = vpop.eup %1926  ;;  %v882_v27 = vsub.f32 1.5, %v881_v3  ;;  %v2480_v13 = vmax.f32 %v587_v63, 1e-12  ;;  %v2482_v15 = vmax.f32 %v619_v1, 1e-12 }
 0x160   : > { %v2485_v38 = vpop.eup %1928  ;;  %v729_v43 = vmul.f32 %v2478_v14, %v2460_v48  ;;  %v723_v8 = vmul.f32 %v1923_v44, %v722_v11  ;;  %vm735_vm4 = vweird.f32 %v2478_v14 }
 0x161   : > { %v889_v35 = vmul.f32 %v2485_v38, %v2462_v7  ;;  %1930 = vrsqrt.f32 %v2480_v13  ;;  %v883_v36 = vmul.f32 %v1925_v29, %v882_v27  ;;  %vm2521_vm6 = vmor %vm734_vm5, %vm735_vm4  ;;  %vm895_vm7 = vweird.f32 %v2485_v38 }
 0x162   : > { %v730_v32 = vmul.f32 %v2478_v14, %v729_v43  ;;  %1932 = vrsqrt.f32 %v2482_v15  ;;  %v727_v57 = vsel %vm726_vm15, %v1923_v44, %v723_v8  ;;  %v1008_v44 = vmul.f32 %v877_v33, %v2244_v53  ;;  %vm2548_vm14 = vmor %vm894_vm9, %vm895_vm7 }
 0x163   : > { %v890_v20 = vmul.f32 %v2485_v38, %v889_v35  ;;  %v993_v28 = vmul.f32 %v727_v57, %v2249_v56  ;;  %v887_v24 = vsel %vm886_vm3, %v1925_v29, %v883_v36  ;;  %vm744_vm10 = vweird.f32 %v2480_v13 }
 0x164   : > { %v731_v54 = vmul.f32 0.5, %v730_v32  ;;  %v1009_v49 = vmul.f32 %v887_v24, %v2252_v58  ;;  %vm904_vm12 = vweird.f32 %v2482_v15 }
 0x165   : > { %v1022_v39 = vpack.c.bf16 %v993_v28, %v992_v21  ;;  %v891_v40 = vmul.f32 0.5, %v890_v20 }
 0x166   : > { %v732_v42 = vsub.f32 1.5, %v731_v54  ;;  %v589_v52 = vpop.xlane.xlu0 %588  ;;  %v621_v30 = vpop.xlane.xlu1 %620  ;;  %v1030_v26 = vpack.c.bf16 %v1009_v49, %v1008_v44 }
 0x167   : > { %v1931_v41 = vpop.eup %1930  ;;  %v2510_v47 = vmax.f32 %v589_v52, 1e-12  ;;  %v2512_v56 = vmax.f32 %v621_v30, 1e-12  ;;  %1122 = vmatmul.bf16.gmra.mxu1 %v1022_v39  ;;  %v892_v51 = vsub.f32 1.5, %v891_v40 }
 0x168   : > { %v1933_v17 = vpop.eup %1932  ;;  %v739_v55 = vmul.f32 %v1931_v41, %v2480_v13  ;;  %1162 = vmatmul.bf16.gmra.mxu3 %v1030_v26  ;;  %v733_v58 = vmul.f32 %v2478_v14, %v732_v42  ;;  %vm745_vm8 = vweird.f32 %v1931_v41 }
 0x169   : > { %v899_v29 = vmul.f32 %v1933_v17, %v2482_v15  ;;  %1934 = vrsqrt.f32 %v2510_v47  ;;  %v893_v46 = vmul.f32 %v2485_v38, %v892_v51  ;;  %vm746_vm11 = vmor %vm744_vm10, %vm745_vm8  ;;  %vm905_vm13 = vweird.f32 %v1933_v17 }
 0x16a   : > { %v740_v53 = vmul.f32 %v1931_v41, %v739_v55  ;;  %1936 = vrsqrt.f32 %v2512_v56  ;;  %v737_v60 = vsel %vm2521_vm6, %v2478_v14, %v733_v58  ;;  %vm906_vm15 = vmor %vm904_vm12, %vm905_vm13  ;;  %vm754_vm0 = vweird.f32 %v2510_v47 }
 0x16b   : > { %v900_v31 = vmul.f32 %v1933_v17, %v899_v29  ;;  %v994_v28 = vmul.f32 %v737_v60, %v2259_v62  ;;  %v897_v36 = vsel %vm2548_vm14, %v2485_v38, %v893_v46  ;;  %vm914_vm3 = vweird.f32 %v2512_v56 }
 0x16c   : > { %v741_v3 = vmul.f32 0.5, %v740_v53  ;;  %v1010_v49 = vmul.f32 %v897_v36, %v2262_v0 }
 0x16d   : > { %v901_v63 = vmul.f32 0.5, %v900_v31 }
 0x16e   : > { %v742_v1 = vsub.f32 1.5, %v741_v3  ;;  %v623_v2 = vpop.xlane.xlu2 %622  ;;  %v591_v27 = vpop.xlane.xlu1 %590 }
 0x16f   : > { %v2529_v43 = vpop.eup %1934  ;;  %v902_v8 = vsub.f32 1.5, %v901_v63  ;;  %v2531_v48 = vmax.f32 %v623_v2, 1e-12  ;;  %v2533_v35 = vmax.f32 %v591_v27, 1e-12 }
 0x170   : > { %v2536_v32 = vpop.eup %1936  ;;  %v749_v57 = vmul.f32 %v2529_v43, %v2510_v47  ;;  %v743_v21 = vmul.f32 %v1931_v41, %v742_v1  ;;  %vm755_vm2 = vweird.f32 %v2529_v43 }
 0x171   : > { %v909_v14 = vmul.f32 %v2536_v32, %v2512_v56  ;;  %1938 = vrsqrt.f32 %v2531_v48  ;;  %v903_v54 = vmul.f32 %v1933_v17, %v902_v8  ;;  %vm915_vm1 = vweird.f32 %v2536_v32  ;;  %vm2597_vm8 = vmor %vm754_vm0, %vm755_vm2 }
 0x172   : > { %v750_v7 = vmul.f32 %v2529_v43, %v749_v57  ;;  %1940 = vrsqrt.f32 %v2533_v35  ;;  %v747_v13 = vsel %vm746_vm11, %v1931_v41, %v743_v21  ;;  %vm2586_vm5 = vmor %vm914_vm3, %vm915_vm1  ;;  %vm924_vm6 = vweird.f32 %v2531_v48 }
 0x173   : > { %v910_v15 = vmul.f32 %v2536_v32, %v909_v14  ;;  %v995_v33 = vmul.f32 %v747_v13, %v2269_v4  ;;  %v907_v42 = vsel %vm906_vm15, %v1933_v17, %v903_v54  ;;  %vm764_vm9 = vweird.f32 %v2533_v35 }
 0x174   : > { %v751_v52 = vmul.f32 0.5, %v750_v7  ;;  %v1011_v62 = vmul.f32 %v907_v42, %v2272_v6 }
 0x175   : > { %v911_v39 = vmul.f32 0.5, %v910_v15  ;;  %v1023_v24 = vpack.c.bf16 %v995_v33, %v994_v28 }
 0x176   : > { %v625_v30 = vpop.xlane.xlu2 %624  ;;  %v593_v44 = vpop.xlane.xlu1 %592  ;;  %v1031_v26 = vpack.c.bf16 %v1011_v62, %v1010_v49  ;;  %v752_v53 = vsub.f32 1.5, %v751_v52 }
 0x177   : > { %v1939_v41 = vpop.eup %1938  ;;  %v2562_v40 = vmax.f32 %v625_v30, 1e-12  ;;  %v2564_v4 = vmax.f32 %v593_v44, 1e-12  ;;  %1127 = vmatmul.bf16.gmra.mxu1 %v1023_v24  ;;  %v912_v29 = vsub.f32 1.5, %v911_v39 }
 0x178   : > { %v1941_v55 = vpop.eup %1940  ;;  %v919_v38 = vmul.f32 %v1939_v41, %v2531_v48  ;;  %1167 = vmatmul.bf16.gmra.mxu3 %v1031_v26  ;;  %v753_v1 = vmul.f32 %v2529_v43, %v752_v53  ;;  %vm925_vm4 = vweird.f32 %v1939_v41 }
 0x179   : > { %v759_v17 = vmul.f32 %v1941_v55, %v2533_v35  ;;  %1942 = vrsqrt.f32 %v2562_v40  ;;  %v913_v31 = vmul.f32 %v2536_v32, %v912_v29  ;;  %vm765_vm7 = vweird.f32 %v1941_v55  ;;  %vm926_vm10 = vmor %vm924_vm6, %vm925_vm4 }
 0x17a   : > { %v920_v58 = vmul.f32 %v1939_v41, %v919_v38  ;;  %1944 = vrsqrt.f32 %v2564_v4  ;;  %v757_v47 = vsel %vm2597_vm8, %v2529_v43, %v753_v1  ;;  %vm766_vm11 = vmor %vm764_vm9, %vm765_vm7  ;;  %vm774_vm14 = vweird.f32 %v2564_v4 }
 0x17b   : > { %v760_v0 = vmul.f32 %v1941_v55, %v759_v17  ;;  %v917_v48 = vsel %vm2586_vm5, %v2536_v32, %v913_v31  ;;  %v996_v54 = vmul.f32 %v757_v47, %v2279_v10  ;;  %vm934_vm0 = vweird.f32 %v2562_v40 }
 0x17c   : > { %v921_v6 = vmul.f32 0.5, %v920_v58  ;;  %v1012_v33 = vmul.f32 %v917_v48, %v2282_v12 }
 0x17d   : > { %v761_v51 = vmul.f32 0.5, %v760_v0 }
 0x17e   : > { %v922_v3 = vsub.f32 1.5, %v921_v6  ;;  %v595_v11 = vpop.xlane.xlu2 %594  ;;  %v627_v63 = vpop.xlane.xlu0 %626 }
 0x17f   : > { %v2576_v2 = vpop.eup %1942  ;;  %v762_v27 = vsub.f32 1.5, %v761_v51  ;;  %v2578_v60 = vmax.f32 %v595_v11, 1e-12  ;;  %v2580_v8 = vmax.f32 %v627_v63, 1e-12 }
 0x180   : > { %v2582_v46 = vpop.eup %1944  ;;  %v929_v56 = vmul.f32 %v2576_v2, %v2562_v40  ;;  %v923_v21 = vmul.f32 %v1939_v41, %v922_v3  ;;  %vm935_vm13 = vweird.f32 %v2576_v2 }
 0x181   : > { %v769_v20 = vmul.f32 %v2582_v46, %v2564_v4  ;;  %1946 = vrsqrt.f32 %v2578_v60  ;;  %v763_v35 = vmul.f32 %v1941_v55, %v762_v27  ;;  %vm775_vm12 = vweird.f32 %v2582_v46  ;;  %vm2647_vm2 = vmor %vm934_vm0, %vm935_vm13 }
 0x182   : > { %v930_v7 = vmul.f32 %v2576_v2, %v929_v56  ;;  %1948 = vrsqrt.f32 %v2580_v8  ;;  %v927_v28 = vsel %vm926_vm10, %v1939_v41, %v923_v21  ;;  %vm2635_vm1 = vmor %vm774_vm14, %vm775_vm12  ;;  %vm784_vm3 = vweird.f32 %v2578_v60 }
 0x183   : > { %v770_v13 = vmul.f32 %v2582_v46, %v769_v20  ;;  %v767_v15 = vsel %vm766_vm11, %v1941_v55, %v763_v35  ;;  %v1013_v32 = vmul.f32 %v927_v28, %v2292_v18  ;;  %vm944_vm5 = vweird.f32 %v2580_v8 }
 0x184   : > { %v997_v39 = vmul.f32 %v767_v15, %v2289_v16  ;;  %v931_v24 = vmul.f32 0.5, %v930_v7 }
 0x185   : > { %v771_v36 = vmul.f32 0.5, %v770_v13  ;;  %v1032_v30 = vpack.c.bf16 %v1013_v32, %v1012_v33 }
 0x186   : > { %v597_v42 = vpop.xlane.xlu2 %596  ;;  %v629_v52 = vpop.xlane.xlu0 %628  ;;  %v1024_v62 = vpack.c.bf16 %v997_v39, %v996_v54  ;;  %v932_v10 = vsub.f32 1.5, %v931_v24 }
 0x187   : > { %v1947_v43 = vpop.eup %1946  ;;  %v2619_v44 = vmax.f32 %v597_v42, 1e-12  ;;  %v2621_v49 = vmax.f32 %v629_v52, 1e-12  ;;  %v772_v55 = vsub.f32 1.5, %v771_v36 }
 0x188   : > { %v1949_v41 = vpop.eup %1948  ;;  %v779_v12 = vmul.f32 %v1947_v43, %v2578_v60  ;;  %1132 = vmatmul.bf16.gmra.mxu1 %v1024_v62  ;;  %1172 = vmatmul.bf16.gmra.mxu3 %v1032_v30  ;;  %vm785_vm15 = vweird.f32 %v1947_v43  ;;  %v933_v6 = vmul.f32 %v2576_v2, %v932_v10 }
 0x189   : > { %v939_v18 = vmul.f32 %v1949_v41, %v2580_v8  ;;  %1950 = vrsqrt.f32 %v2619_v44  ;;  %v773_v29 = vmul.f32 %v2582_v46, %v772_v55  ;;  %vm786_vm4 = vmor %vm784_vm3, %vm785_vm15  ;;  %vm945_vm6 = vweird.f32 %v1949_v41 }
 0x18a   : > { %v780_v16 = vmul.f32 %v1947_v43, %v779_v12  ;;  %1952 = vrsqrt.f32 %v2621_v49  ;;  %vm946_vm7 = vmor %vm944_vm5, %vm945_vm6  ;;  %vm794_vm9 = vweird.f32 %v2619_v44  ;;  %vm954_vm13 = vweird.f32 %v2621_v49 }
 0x18b   : > { %v940_v38 = vmul.f32 %v1949_v41, %v939_v18  ;;  %v777_v27 = vsel %vm2635_vm1, %v2582_v46, %v773_v29  ;;  %v937_v46 = vsel %vm2647_vm2, %v2576_v2, %v933_v6 }
 0x18c   : > { %v781_v26 = vmul.f32 0.5, %v780_v16  ;;  %v998_v20 = vmul.f32 %v777_v27, %v2299_v22  ;;  %v1014_v33 = vmul.f32 %v937_v46, %v2302_v25 }
 0x18d   : > { %v941_v17 = vmul.f32 0.5, %v940_v38 }
 0x18e   : > { %v782_v53 = vsub.f32 1.5, %v781_v26  ;;  %v599_v58 = vpop.xlane.xlu0 %598  ;;  %v631_v0 = vpop.xlane.xlu1 %630 }
 0x18f   : > { %v2632_v51 = vpop.eup %1950  ;;  %v942_v3 = vsub.f32 1.5, %v941_v17  ;;  %v2639_v11 = vmax.f32 %v599_v58, 1e-12  ;;  %v2641_v63 = vmax.f32 %v631_v0, 1e-12 }
 0x190   : > { %v2643_v4 = vpop.eup %1952  ;;  %v789_v40 = vmul.f32 %v2632_v51, %v2619_v44  ;;  %v783_v57 = vmul.f32 %v1947_v43, %v782_v53  ;;  %vm795_vm8 = vweird.f32 %v2632_v51 }
 0x191   : > { %v949_v56 = vmul.f32 %v2643_v4, %v2621_v49  ;;  %1954 = vrsqrt.f32 %v2639_v11  ;;  %v943_v48 = vmul.f32 %v1949_v41, %v942_v3  ;;  %vm2683_vm10 = vmor %vm794_vm9, %vm795_vm8  ;;  %vm955_vm11 = vweird.f32 %v2643_v4 }
 0x192   : > { %v790_v60 = vmul.f32 %v2632_v51, %v789_v40  ;;  %1956 = vrsqrt.f32 %v2641_v63  ;;  %v787_v21 = vsel %vm786_vm4, %v1947_v43, %v783_v57  ;;  %vm804_vm14 = vweird.f32 %v2639_v11  ;;  %vm956_vm2 = vmor %vm954_vm13, %vm955_vm11 }
 0x193   : > { %v950_v14 = vmul.f32 %v2643_v4, %v949_v56  ;;  %v999_v8 = vmul.f32 %v787_v21, %v2315_v34  ;;  %v947_v35 = vsel %vm946_vm7, %v1949_v41, %v943_v48  ;;  %vm964_vm0 = vweird.f32 %v2641_v63 }
 0x194   : > { %v791_v7 = vmul.f32 0.5, %v790_v60  ;;  %v1015_v32 = vmul.f32 %v947_v35, %v2318_v37 }
 0x195   : > { %v1025_v47 = vpack.c.bf16 %v999_v8, %v998_v20  ;;  %v951_v2 = vmul.f32 0.5, %v950_v14 }
 0x196   : > { %v792_v13 = vsub.f32 1.5, %v791_v7  ;;  %v601_v28 = vpop.xlane.xlu0 %600  ;;  %v633_v15 = vpop.xlane.xlu1 %632  ;;  %v1033_v24 = vpack.c.bf16 %v1015_v32, %v1014_v33 }
 0x197   : > { %v1955_v36 = vpop.eup %1954  ;;  %v2672_v54 = vmax.f32 %v601_v28, 1e-12  ;;  %v2674_v39 = vmax.f32 %v633_v15, 1e-12  ;;  %v952_v52 = vsub.f32 1.5, %v951_v2 }
 0x198   : > { %v1957_v22 = vpop.eup %1956  ;;  %v799_v34 = vmul.f32 %v1955_v36, %v2639_v11  ;;  %1137 = vmatmul.bf16.gmra.mxu1 %v1025_v47  ;;  %1177 = vmatmul.bf16.gmra.mxu3 %v1033_v24  ;;  %v793_v37 = vmul.f32 %v2632_v51, %v792_v13  ;;  %vm805_vm12 = vweird.f32 %v1955_v36 }
 0x199   : > { %v959_v42 = vmul.f32 %v1957_v22, %v2641_v63  ;;  %1958 = vrsqrt.f32 %v2672_v54  ;;  %v953_v29 = vmul.f32 %v2643_v4, %v952_v52  ;;  %vm806_vm15 = vmor %vm804_vm14, %vm805_vm12  ;;  %vm965_vm1 = vweird.f32 %v1957_v22 }
 0x19a   : > { %v800_v25 = vmul.f32 %v1955_v36, %v799_v34  ;;  %1960 = vrsqrt.f32 %v2674_v39  ;;  %v797_v10 = vsel %vm2683_vm10, %v2632_v51, %v793_v37  ;;  %vm966_vm3 = vmor %vm964_vm0, %vm965_vm1  ;;  %vm814_vm6 = vweird.f32 %v2672_v54  ;;  %v2733_v37 = vld [vmem:[%s3205_s5] ss:$0 sm:$0xff] }
 0x19b   : > { %v960_v30 = vmul.f32 %v1957_v22, %v959_v42  ;;  %v1000_v51 = vmul.f32 %v797_v10, %v2328_v45  ;;  %v957_v11 = vsel %vm956_vm2, %v2643_v4, %v953_v29  ;;  %vm974_vm9 = vweird.f32 %v2674_v39 }
 0x19c   : > { %v801_v43 = vmul.f32 0.5, %v800_v25  ;;  %v1016_v56 = vmul.f32 %v957_v11, %v2334_v50 }
 0x19d   : > { %v961_v41 = vmul.f32 0.5, %v960_v30 }
 0x19e   : > { %v802_v55 = vsub.f32 1.5, %v801_v43  ;;  %v635_v12 = vpop.xlane.xlu2 %634  ;;  %v603_v18 = vpop.xlane.xlu1 %602 }
 0x19f   : > { %v2691_v16 = vpop.eup %1958  ;;  %v962_v38 = vsub.f32 1.5, %v961_v41  ;;  %v667_v44 = vmax.f32 %v635_v12, 1e-12  ;;  %v651_v26 = vmax.f32 %v603_v18, 1e-12 }
 0x1a0   : > { %v2694_v17 = vpop.eup %1960  ;;  %v809_v53 = vmul.f32 %v2691_v16, %v2672_v54  ;;  %v803_v58 = vmul.f32 %v1955_v36, %v802_v55  ;;  %vm815_vm4 = vweird.f32 %v2691_v16 }
 0x1a1   : > { %v969_v0 = vmul.f32 %v2694_v17, %v2674_v39  ;;  %1962 = vrsqrt.f32 %v667_v44  ;;  %v963_v63 = vmul.f32 %v1957_v22, %v962_v38  ;;  %vm975_vm5 = vweird.f32 %v2694_v17  ;;  %vm2717_vm8 = vmor %vm814_vm6, %vm815_vm4 }
 0x1a2   : > { %v810_v6 = vmul.f32 %v2691_v16, %v809_v53  ;;  %1964 = vrsqrt.f32 %v651_v26  ;;  %v807_v49 = vsel %vm806_vm15, %v1955_v36, %v803_v58  ;;  %vm976_vm11 = vmor %vm974_vm9, %vm975_vm5  ;;  %vm984_vm12 = vweird.f32 %v667_v44 }
 0x1a3   : > { %v970_v31 = vmul.f32 %v2694_v17, %v969_v0  ;;  %v1001_v3 = vmul.f32 %v807_v49, %v2347_v59  ;;  %v967_v57 = vsel %vm966_vm3, %v1957_v22, %v963_v63  ;;  %vm824_vm14 = vweird.f32 %v651_v26 }
 0x1a4   : > { %v811_v1 = vmul.f32 0.5, %v810_v6  ;;  %v1017_v60 = vmul.f32 %v967_v57, %v2350_v61 }
 0x1a5   : > { %v971_v40 = vmul.f32 0.5, %v970_v31  ;;  %v1026_v27 = vpack.c.bf16 %v1001_v3, %v1000_v51 }
 0x1a6   : > { %v1034_v45 = vpack.c.bf16 %v1017_v60, %v1016_v56  ;;  %v812_v20 = vsub.f32 1.5, %v811_v1 }
 0x1a7   : > { %v1963_v21 = vpop.eup %1962  ;;  %v972_v8 = vsub.f32 1.5, %v971_v40 }
 0x1a8   : > { %v1965_v46 = vpop.eup %1964  ;;  %v979_v14 = vmul.f32 %v1963_v21, %v667_v44  ;;  %1142 = vmatmul.bf16.gmra.mxu1 %v1026_v27  ;;  %1182 = vmatmul.bf16.gmra.mxu3 %v1034_v45  ;;  %v813_v50 = vmul.f32 %v2691_v16, %v812_v20  ;;  %vm985_vm7 = vweird.f32 %v1963_v21 }
 0x1a9   : > { %v819_v48 = vmul.f32 %v1965_v46, %v651_v26  ;;  %v973_v61 = vmul.f32 %v2694_v17, %v972_v8  ;;  %vm825_vm10 = vweird.f32 %v1965_v46  ;;  %vm986_vm13 = vmor %vm984_vm12, %vm985_vm7 }
 0x1aa   : > { %v980_v59 = vmul.f32 %v1963_v21, %v979_v14  ;;  %v817_v33 = vsel %vm2717_vm8, %v2691_v16, %v813_v50  ;;  %vm826_vm15 = vmor %vm824_vm14, %vm825_vm10 }
 0x1ab   : > { %v820_v4 = vmul.f32 %v1965_v46, %v819_v48  ;;  %v977_v36 = vsel %vm976_vm11, %v2694_v17, %v973_v61  ;;  %v1002_v39 = vmul.f32 %v817_v33, %v2360_v5 }
 0x1ac   : > { %v981_v7 = vmul.f32 0.5, %v980_v59  ;;  %v1018_v24 = vmul.f32 %v977_v36, %v2366_v9 }
 0x1ad   : > { %v821_v47 = vmul.f32 0.5, %v820_v4 }
 0x1ae   : > { %v982_v35 = vsub.f32 1.5, %v981_v7 }
 0x1af   : > { %v822_v28 = vsub.f32 1.5, %v821_v47 }
 0x1b0   : > { %v983_v15 = vmul.f32 %v1963_v21, %v982_v35 }
 0x1b1   : > { %v823_v32 = vmul.f32 %v1965_v46, %v822_v28 }
 0x1b2   : > { %v987_v2 = vsel %vm986_vm13, %v1963_v21, %v983_v15 }
 0x1b3   : > { %v827_v54 = vsel %vm826_vm15, %v1965_v46, %v823_v32  ;;  %v1019_v22 = vmul.f32 %v987_v2, %v2376_v23 }
 0x1b4   : > { %v1003_v34 = vmul.f32 %v827_v54, %v2373_v19 }
 0x1b5   : > { %v1035_v25 = vpack.c.bf16 %v1019_v22, %v1018_v24 }
 0x1b6   : > { %v1027_v42 = vpack.c.bf16 %v1003_v34, %v1002_v39 }
 0x1b8   : > { %1147 = vmatmul.bf16.gmra.mxu1 %v1027_v42  ;;  %1187 = vmatmul.bf16.gmra.mxu3 %v1035_v25 }
 0x1be   : > { %v1113_v52 = vpop.f32.mrf.mxu1 }
 0x1bf   : > { %v2736_v30 = vadd.f32 %v2733_v37, %v1113_v52 }
 0x1c1   : > { %1193 = vmax.xlane.f32.xlu2 %v2736_v30 }
 0x1c6   : > { %v1115_v5 = vpop.f32.mrf.mxu1 }
 0x1c7   : > { %v2740_v19 = vadd.f32 %v2733_v37, %v1115_v5 }
 0x1c9   : > { %1195 = vmax.xlane.f32.xlu0 %v2740_v19 }
 0x1ca   : > { %v1153_v9 = vpop.f32.mrf.mxu3 }
 0x1cb   : > { %v2744_v43 = vadd.f32 %v2733_v37, %v1153_v9 }
 0x1ce   : > { %v1118_v23 = vpop.f32.mrf.mxu1 }
 0x1cf   : > { %v2747_v62 = vadd.f32 %v2733_v37, %v1118_v23 }
 0x1d1   : > { %1225 = vmax.xlane.f32.xlu0 %v2744_v43  ;;  %1197 = vmax.xlane.f32.xlu1 %v2747_v62 }
 0x1d2   : > { %v1155_v41 = vpop.f32.mrf.mxu3 }
 0x1d3   : > { %v2752_v12 = vadd.f32 %v2733_v37, %v1155_v41 }
 0x1d6   : > { %v1120_v55 = vpop.f32.mrf.mxu1 }
 0x1d7   : > { %v2755_v18 = vadd.f32 %v2733_v37, %v1120_v55 }
 0x1d9   : > { %1199 = vmax.xlane.f32.xlu2 %v2755_v18  ;;  %1227 = vmax.xlane.f32.xlu1 %v2752_v12 }
 0x1da   : > { %v1158_v10 = vpop.f32.mrf.mxu3 }
 0x1db   : > { %v2760_v16 = vadd.f32 %v2733_v37, %v1158_v10 }
 0x1e1   : > { %1229 = vmax.xlane.f32.xlu2 %v2760_v16 }
 0x1e2   : > { %v1160_v38 = vpop.f32.mrf.mxu3 }
 0x1e3   : > { %v2768_v17 = vadd.f32 %v2733_v37, %v1160_v38 }
 0x1e4   : > { %v1123_v44 = vpop.f32.mrf.mxu1 }
 0x1e5   : > { %v2764_v26 = vadd.f32 %v2733_v37, %v1123_v44 }
 0x1e7   : > { %1201 = vmax.xlane.f32.xlu0 %v2764_v26 }
 0x1eb   : > { %v1163_v53 = vpop.f32.mrf.mxu3 }
 0x1ec   : > { %v1125_v29 = vpop.f32.mrf.mxu1  ;;  %v2776_v6 = vadd.f32 %v2733_v37, %v1163_v53 }
 0x1ed   : > { %v2771_v58 = vadd.f32 %v2733_v37, %v1125_v29 }
 0x1ef   : > { %1203 = vmax.xlane.f32.xlu1 %v2771_v58  ;;  %1231 = vmax.xlane.f32.xlu0 %v2768_v17 }
 0x1f3   : > { %v1165_v49 = vpop.f32.mrf.mxu3 }
 0x1f4   : > { %v1128_v0 = vpop.f32.mrf.mxu1  ;;  %v2784_v3 = vadd.f32 %v2733_v37, %v1165_v49 }
 0x1f5   : > { %v2779_v51 = vadd.f32 %v2733_v37, %v1128_v0 }
 0x1f7   : > { %1205 = vmax.xlane.f32.xlu2 %v2779_v51  ;;  %1233 = vmax.xlane.f32.xlu1 %v2776_v6 }
 0x1fb   : > { %v1168_v11 = vpop.f32.mrf.mxu3 }
 0x1fc   : > { %v1130_v31 = vpop.f32.mrf.mxu1  ;;  %v2792_v1 = vadd.f32 %v2733_v37, %v1168_v11 }
 0x1fd   : > { %v2787_v63 = vadd.f32 %v2733_v37, %v1130_v31 }
 0x1ff   : > { %1235 = vmax.xlane.f32.xlu2 %v2784_v3  ;;  %1207 = vmax.xlane.f32.xlu0 %v2787_v63 }
 0x203   : > { %v1170_v40 = vpop.f32.mrf.mxu3 }
 0x204   : > { %v2800_v21 = vadd.f32 %v2733_v37, %v1170_v40 }
 0x205   : > { %v1133_v27 = vpop.f32.mrf.mxu1 }
 0x206   : > { %v2795_v57 = vadd.f32 %v2733_v37, %v1133_v27 }
 0x207   : > { %1237 = vmax.xlane.f32.xlu0 %v2792_v1 }
 0x208   : > { %1209 = vmax.xlane.f32.xlu1 %v2795_v57 }
 0x20b   : > { %v1173_v56 = vpop.f32.mrf.mxu3 }
 0x20c   : > { %v2808_v20 = vadd.f32 %v2733_v37, %v1173_v56 }
 0x20d   : > { %v1135_v60 = vpop.f32.mrf.mxu1 }
 0x20e   : > { %v2803_v46 = vadd.f32 %v2733_v37, %v1135_v60  ;;  %3245 = vst [vmem:[#allocation2_spill] sm:$0xff] %v2808_v20 }
 0x210   : > { %1211 = vmax.xlane.f32.xlu2 %v2803_v46  ;;  %1239 = vmax.xlane.f32.xlu1 %v2800_v21 }
 0x213   : > { %v1175_v14 = vpop.f32.mrf.mxu3 }
 0x214   : > { %v2816_v4 = vadd.f32 %v2733_v37, %v1175_v14 }
 0x215   : > { %v1138_v45 = vpop.f32.mrf.mxu1 }
 0x216   : > { %v2811_v8 = vadd.f32 %v2733_v37, %v1138_v45  ;;  %3247 = vst [vmem:[#allocation4_spill] sm:$0xff] %v2816_v4 }
 0x218   : > { %3246 = vst [vmem:[#allocation3_spill] sm:$0xff] %v2811_v8  ;;  %1241 = vmax.xlane.f32.xlu2 %v2808_v20  ;;  %1213 = vmax.xlane.f32.xlu0 %v2811_v8 }
 0x21b   : > { %v1178_v48 = vpop.f32.mrf.mxu3 }
 0x21c   : > { %v2824_v61 = vadd.f32 %v2733_v37, %v1178_v48 }
 0x21d   : > { %v1140_v59 = vpop.f32.mrf.mxu1 }
 0x21e   : > { %v2819_v7 = vadd.f32 %v2733_v37, %v1140_v59  ;;  %3249 = vst [vmem:[#allocation6_spill] sm:$0xff] %v2824_v61 }
 0x220   : > { %3248 = vst [vmem:[#allocation5_spill] sm:$0xff] %v2819_v7  ;;  %1215 = vmax.xlane.f32.xlu1 %v2819_v7  ;;  %1243 = vmax.xlane.f32.xlu0 %v2816_v4 }
 0x223   : > { %v1180_v47 = vpop.f32.mrf.mxu3 }
 0x224   : > { %v2832_v15 = vadd.f32 %v2733_v37, %v1180_v47 }
 0x225   : > { %v1143_v50 = vpop.f32.mrf.mxu1 }
 0x226   : > { %v2827_v35 = vadd.f32 %v2733_v37, %v1143_v50  ;;  %3251 = vst [vmem:[#allocation8_spill] sm:$0xff] %v2832_v15 }
 0x228   : > { %3250 = vst [vmem:[#allocation7_spill] sm:$0xff] %v2827_v35  ;;  %1217 = vmax.xlane.f32.xlu2 %v2827_v35  ;;  %1245 = vmax.xlane.f32.xlu1 %v2824_v61 }
 0x22b   : > { %v1183_v13 = vpop.f32.mrf.mxu3 }
 0x22c   : > { %v2840_v2 = vadd.f32 %v2733_v37, %v1183_v13 }
 0x22d   : > { %v1145_v28 = vpop.f32.mrf.mxu1 }
 0x22e   : > { %v2835_v33 = vadd.f32 %v2733_v37, %v1145_v28  ;;  %3253 = vst [vmem:[#allocation10_spill] sm:$0xff] %v2840_v2 }
 0x230   : > { %3252 = vst [vmem:[#allocation9_spill] sm:$0xff] %v2835_v33  ;;  %1247 = vmax.xlane.f32.xlu2 %v2832_v15  ;;  %1219 = vmax.xlane.f32.xlu0 %v2835_v33 }
 0x233   : > { %v1185_v32 = vpop.f32.mrf.mxu3 }
 0x234   : > { %v1194_v54 = vpop.xlane.xlu2 %1193  ;;  %v2849_v52 = vadd.f32 %v2733_v37, %v1185_v32 }
 0x235   : > { %v1148_v36 = vpop.f32.mrf.mxu1  ;;  %v1257_v39 = vsub.f32 %v2736_v30, %v1194_v54 }
 0x236   : > { %v2843_v22 = vadd.f32 %v2733_v37, %v1148_v36  ;;  %3255 = vst [vmem:[#allocation12_spill] sm:$0xff] %v2849_v52 }
 0x237   : > { %v1289_v42 = vmul.f32 1.442695, %v1257_v39 }
 0x238   : > { %3254 = vst [vmem:[#allocation11_spill] sm:$0xff] %v2843_v22  ;;  %1249 = vmax.xlane.f32.xlu0 %v2840_v2  ;;  %1221 = vmax.xlane.f32.xlu1 %v2843_v22 }
 0x239   : > { %1966 = vpow2.f32 %v1289_v42 }
 0x23b   : > { %v1188_v24 = vpop.f32.mrf.mxu3 }
 0x23c   : > { %v1196_v34 = vpop.xlane.xlu0 %1195  ;;  %v2862_v29 = vadd.f32 %v2733_v37, %v1188_v24 }
 0x23d   : > { %v1150_v25 = vpop.f32.mrf.mxu1  ;;  %v1258_v9 = vsub.f32 %v2740_v19, %v1196_v34 }
 0x23e   : > { %v2852_v5 = vadd.f32 %v2733_v37, %v1150_v25  ;;  %3258 = vst [vmem:[#allocation15_spill] sm:$0xff] %v2862_v29 }
 0x23f   : > { %v1291_v41 = vmul.f32 1.442695, %v1258_v9  ;;  %v2864_v0 = vpop.eup %1966 }
 0x240   : > { %3256 = vst [vmem:[#allocation13_spill] sm:$0xff] %v2852_v5  ;;  %1223 = vmax.xlane.f32.xlu2 %v2852_v5  ;;  %1251 = vmax.xlane.f32.xlu1 %v2849_v52 }
 0x241   : > { %1968 = vpow2.f32 %v1291_v41 }
 0x243   : > { %v1190_v55 = vpop.f32.mrf.mxu3 }
 0x244   : > { %v1198_v23 = vpop.xlane.xlu1 %1197  ;;  %v1226_v10 = vpop.xlane.xlu0 %1225  ;;  %v2859_v44 = vadd.f32 %v2733_v37, %v1190_v55 }
 0x245   : > { %v1259_v38 = vsub.f32 %v2747_v62, %v1198_v23  ;;  %v1273_v49 = vsub.f32 %v2744_v43, %v1226_v10 }
 0x246   : > { %3257 = vst [vmem:[#allocation14_spill] sm:$0xff] %v2859_v44  ;;  %1255 = vmax.xlane.f32.xlu0 %v2859_v44 }
 0x247   : > { %v1293_v53 = vmul.f32 1.442695, %v1259_v38  ;;  %v1321_v31 = vmul.f32 1.442695, %v1273_v49  ;;  %v2872_v56 = vpop.eup %1968 }
 0x248   : > { %1253 = vmax.xlane.f32.xlu2 %v2862_v29  ;;  %1353 = vadd.xlane.f32.xlu1 %v2864_v0 }
 0x249   : > { %1970 = vpow2.f32 %v1293_v53 }
 0x24a   : > { %1972 = vpow2.f32 %v1321_v31 }
 0x24c   : > { %v1200_v11 = vpop.xlane.xlu2 %1199  ;;  %v1228_v40 = vpop.xlane.xlu1 %1227 }
 0x24d   : > { %v1260_v27 = vsub.f32 %v2755_v18, %v1200_v11  ;;  %v1274_v37 = vsub.f32 %v2752_v12, %v1228_v40 }
 0x24f   : > { %v1295_v60 = vmul.f32 1.442695, %v1260_v27  ;;  %v1323_v14 = vmul.f32 1.442695, %v1274_v37  ;;  %v2874_v45 = vpop.eup %1970 }
 0x250   : > { %1355 = vadd.xlane.f32.xlu2 %v2872_v56  ;;  %1357 = vadd.xlane.f32.xlu0 %v2874_v45  ;;  %v2879_v47 = vpop.eup %1972 }
 0x251   : > { %1974 = vpow2.f32 %v1295_v60 }
 0x252   : > { %1976 = vpow2.f32 %v1323_v14 }
 0x254   : > { %v1230_v48 = vpop.xlane.xlu2 %1229 }
 0x255   : > { %v1275_v59 = vsub.f32 %v2760_v16, %v1230_v48 }
 0x257   : > { %v2881_v50 = vpop.eup %1974  ;;  %v1325_v13 = vmul.f32 1.442695, %v1275_v59 }
 0x258   : > { %v2883_v28 = vpop.eup %1976  ;;  %1359 = vadd.xlane.f32.xlu1 %v2881_v50  ;;  %1385 = vadd.xlane.f32.xlu2 %v2879_v47 }
 0x259   : > { %1978 = vpow2.f32 %v1325_v13  ;;  %1387 = vadd.xlane.f32.xlu0 %v2883_v28 }
 0x25a   : > { %v1202_v32 = vpop.xlane.xlu0 %1201 }
 0x25b   : > { %v1261_v36 = vsub.f32 %v2764_v26, %v1202_v32 }
 0x25d   : > { %v1297_v54 = vmul.f32 1.442695, %v1261_v36 }
 0x25f   : > { %v2889_v39 = vpop.eup %1978  ;;  %1980 = vpow2.f32 %v1297_v54 }
 0x260   : > { %1389 = vadd.xlane.f32.xlu1 %v2889_v39 }
 0x262   : > { %v1232_v34 = vpop.xlane.xlu0 %1231  ;;  %v1204_v24 = vpop.xlane.xlu1 %1203 }
 0x263   : > { %v1276_v42 = vsub.f32 %v2768_v17, %v1232_v34  ;;  %v1262_v25 = vsub.f32 %v2771_v58, %v1204_v24 }
 0x265   : > { %v2894_v9 = vpop.eup %1980  ;;  %v1327_v23 = vmul.f32 1.442695, %v1276_v42  ;;  %v1299_v41 = vmul.f32 1.442695, %v1262_v25 }
 0x266   : > { %1361 = vadd.xlane.f32.xlu2 %v2894_v9 }
 0x267   : > { %1982 = vpow2.f32 %v1327_v23 }
 0x268   : > { %1984 = vpow2.f32 %v1299_v41 }
 0x26a   : > { %v1206_v55 = vpop.xlane.xlu2 %1205  ;;  %v1234_v10 = vpop.xlane.xlu1 %1233 }
 0x26b   : > { %v1263_v38 = vsub.f32 %v2779_v51, %v1206_v55  ;;  %v1277_v53 = vsub.f32 %v2776_v6, %v1234_v10 }
 0x26d   : > { %v2899_v49 = vpop.eup %1982  ;;  %v1301_v31 = vmul.f32 1.442695, %v1263_v38  ;;  %v1329_v11 = vmul.f32 1.442695, %v1277_v53 }
 0x26e   : > { %v2901_v40 = vpop.eup %1984  ;;  %1391 = vadd.xlane.f32.xlu2 %v2899_v49 }
 0x26f   : > { %1986 = vpow2.f32 %v1301_v31  ;;  %1363 = vadd.xlane.f32.xlu0 %v2901_v40 }
 0x270   : > { %1988 = vpow2.f32 %v1329_v11 }
 0x272   : > { %v1236_v27 = vpop.xlane.xlu2 %1235  ;;  %v1208_v37 = vpop.xlane.xlu0 %1207 }
 0x273   : > { %v1278_v60 = vsub.f32 %v2784_v3, %v1236_v27  ;;  %v1264_v14 = vsub.f32 %v2787_v63, %v1208_v37 }
 0x275   : > { %v2907_v48 = vpop.eup %1986  ;;  %v1331_v59 = vmul.f32 1.442695, %v1278_v60  ;;  %v1303_v13 = vmul.f32 1.442695, %v1264_v14 }
 0x276   : > { %v2909_v32 = vpop.eup %1988  ;;  %1365 = vadd.xlane.f32.xlu1 %v2907_v48 }
 0x277   : > { %1990 = vpow2.f32 %v1331_v59  ;;  %1393 = vadd.xlane.f32.xlu0 %v2909_v32 }
 0x278   : > { %1992 = vpow2.f32 %v1303_v13 }
 0x27a   : > { %v1238_v36 = vpop.xlane.xlu0 %1237 }
 0x27b   : > { %v1279_v54 = vsub.f32 %v2792_v1, %v1238_v36  ;;  %v1210_v34 = vpop.xlane.xlu1 %1209 }
 0x27c   : > { %v1265_v25 = vsub.f32 %v2795_v57, %v1210_v34 }
 0x27d   : > { %v2914_v24 = vpop.eup %1990  ;;  %v1333_v42 = vmul.f32 1.442695, %v1279_v54 }
 0x27e   : > { %v2917_v23 = vpop.eup %1992  ;;  %1395 = vadd.xlane.f32.xlu1 %v2914_v24  ;;  %v1305_v41 = vmul.f32 1.442695, %v1265_v25 }
 0x27f   : > { %1994 = vpow2.f32 %v1333_v42  ;;  %1367 = vadd.xlane.f32.xlu2 %v2917_v23 }
 0x280   : > { %1996 = vpow2.f32 %v1305_v41 }
 0x283   : > { %v1212_v55 = vpop.xlane.xlu2 %1211  ;;  %v1240_v10 = vpop.xlane.xlu1 %1239 }
 0x284   : > { %v1266_v53 = vsub.f32 %v2803_v46, %v1212_v55  ;;  %v1280_v31 = vsub.f32 %v2800_v21, %v1240_v10 }
 0x285   : > { %v2921_v38 = vpop.eup %1994 }
 0x286   : > { %v2925_v11 = vpop.eup %1996  ;;  %v1307_v27 = vmul.f32 1.442695, %v1266_v53  ;;  %v1335_v37 = vmul.f32 1.442695, %v1280_v31 }
 0x287   : > { %1397 = vadd.xlane.f32.xlu2 %v2921_v38  ;;  %1369 = vadd.xlane.f32.xlu0 %v2925_v11 }
 0x288   : > { %1998 = vpow2.f32 %v1307_v27 }
 0x289   : > { %2000 = vpow2.f32 %v1335_v37 }
 0x28b   : > { %v1242_v60 = vpop.xlane.xlu2 %1241  ;;  %v1214_v14 = vpop.xlane.xlu0 %1213 }
 0x28c   : > { %v1281_v59 = vsub.f32 %v2808_v20, %v1242_v60  ;;  %v1267_v13 = vsub.f32 %v2811_v8, %v1214_v14 }
 0x28e   : > { %v2931_v36 = vpop.eup %1998  ;;  %v1337_v54 = vmul.f32 1.442695, %v1281_v59  ;;  %v1309_v34 = vmul.f32 1.442695, %v1267_v13 }
 0x28f   : > { %v2933_v42 = vpop.eup %2000  ;;  %1371 = vadd.xlane.f32.xlu1 %v2931_v36 }
 0x290   : > { %2002 = vpow2.f32 %v1337_v54  ;;  %1399 = vadd.xlane.f32.xlu0 %v2933_v42 }
 0x291   : > { %2004 = vpow2.f32 %v1309_v34 }
 0x293   : > { %v1244_v25 = vpop.xlane.xlu0 %1243  ;;  %v1216_v41 = vpop.xlane.xlu1 %1215 }
 0x294   : > { %v1282_v55 = vsub.f32 %v2816_v4, %v1244_v25  ;;  %v1268_v10 = vsub.f32 %v2819_v7, %v1216_v41 }
 0x296   : > { %v2939_v53 = vpop.eup %2002  ;;  %v1339_v31 = vmul.f32 1.442695, %v1282_v55  ;;  %v1311_v27 = vmul.f32 1.442695, %v1268_v10 }
 0x297   : > { %v2941_v37 = vpop.eup %2004  ;;  %1401 = vadd.xlane.f32.xlu1 %v2939_v53 }
 0x298   : > { %2006 = vpow2.f32 %v1339_v31  ;;  %1373 = vadd.xlane.f32.xlu2 %v2941_v37 }
 0x299   : > { %2008 = vpow2.f32 %v1311_v27 }
 0x29b   : > { %v1218_v60 = vpop.xlane.xlu2 %1217  ;;  %v1246_v14 = vpop.xlane.xlu1 %1245 }
 0x29c   : > { %v1269_v59 = vsub.f32 %v2827_v35, %v1218_v60  ;;  %v1283_v13 = vsub.f32 %v2824_v61, %v1246_v14 }
 0x29e   : > { %v2947_v54 = vpop.eup %2006  ;;  %v1313_v34 = vmul.f32 1.442695, %v1269_v59  ;;  %v1341_v25 = vmul.f32 1.442695, %v1283_v13 }
 0x29f   : > { %v2949_v41 = vpop.eup %2008 }
 0x2a0   : > { %2010 = vpow2.f32 %v1313_v34  ;;  %1403 = vadd.xlane.f32.xlu2 %v2947_v54  ;;  %1375 = vadd.xlane.f32.xlu0 %v2949_v41 }
 0x2a1   : > { %2012 = vpow2.f32 %v1341_v25 }
 0x2a3   : > { %v1248_v55 = vpop.xlane.xlu2 %1247  ;;  %v1220_v10 = vpop.xlane.xlu0 %1219 }
 0x2a4   : > { %v1284_v31 = vsub.f32 %v2832_v15, %v1248_v55  ;;  %v1270_v27 = vsub.f32 %v2835_v33, %v1220_v10 }
 0x2a6   : > { %v2955_v60 = vpop.eup %2010  ;;  %v1343_v14 = vmul.f32 1.442695, %v1284_v31  ;;  %v1315_v61 = vmul.f32 1.442695, %v1270_v27 }
 0x2a7   : > { %v2957_v59 = vpop.eup %2012  ;;  %1377 = vadd.xlane.f32.xlu1 %v2955_v60 }
 0x2a8   : > { %2014 = vpow2.f32 %v1343_v14  ;;  %1405 = vadd.xlane.f32.xlu0 %v2957_v59 }
 0x2a9   : > { %2016 = vpow2.f32 %v1315_v61 }
 0x2ab   : > { %v1250_v13 = vpop.xlane.xlu0 %1249  ;;  %v1222_v34 = vpop.xlane.xlu1 %1221 }
 0x2ac   : > { %v1285_v25 = vsub.f32 %v2840_v2, %v1250_v13  ;;  %v1271_v55 = vsub.f32 %v2843_v22, %v1222_v34 }
 0x2ae   : > { %v2963_v15 = vpop.eup %2014  ;;  %v1345_v10 = vmul.f32 1.442695, %v1285_v25  ;;  %v1317_v33 = vmul.f32 1.442695, %v1271_v55 }
 0x2af   : > { %v2965_v31 = vpop.eup %2016  ;;  %1407 = vadd.xlane.f32.xlu1 %v2963_v15 }
 0x2b0   : > { %2018 = vpow2.f32 %v1345_v10  ;;  %1379 = vadd.xlane.f32.xlu2 %v2965_v31 }
 0x2b1   : > { %2020 = vpow2.f32 %v1317_v33 }
 0x2b3   : > { %v1224_v27 = vpop.xlane.xlu2 %1223  ;;  %v1252_v61 = vpop.xlane.xlu1 %1251 }
 0x2b4   : > { %v1272_v14 = vsub.f32 %v2852_v5, %v1224_v27  ;;  %v1286_v13 = vsub.f32 %v2849_v52, %v1252_v61 }
 0x2b6   : > { %v2971_v2 = vpop.eup %2018  ;;  %v1319_v34 = vmul.f32 1.442695, %v1272_v14  ;;  %v1347_v22 = vmul.f32 1.442695, %v1286_v13 }
 0x2b7   : > { %v2973_v25 = vpop.eup %2020 }
 0x2b8   : > { %2022 = vpow2.f32 %v1319_v34  ;;  %1409 = vadd.xlane.f32.xlu2 %v2971_v2  ;;  %1381 = vadd.xlane.f32.xlu0 %v2973_v25 }
 0x2b9   : > { %2024 = vpow2.f32 %v1347_v22  ;;  %v1256_v55 = vpop.xlane.xlu0 %1255  ;;  %v2988_v22 = vld [vmem:[%s3204_s4] ss:$0 sm:$0xff] }
 0x2ba   : > { %v1288_v33 = vsub.f32 %v2859_v44, %v1256_v55 }
 0x2bb   : > { %v1254_v10 = vpop.xlane.xlu2 %1253  ;;  %v1354_v35 = vpop.xlane.xlu1 %1353 }
 0x2bc   : > { %v1287_v27 = vsub.f32 %v2862_v29, %v1254_v10  ;;  %2026 = vrcp.f32 %v1354_v35  ;;  %v1351_v61 = vmul.f32 1.442695, %v1288_v33 }
 0x2be   : > { %v2979_v52 = vpop.eup %2022  ;;  %v1349_v14 = vmul.f32 1.442695, %v1287_v27  ;;  %2028 = vpow2.f32 %v1351_v61 }
 0x2bf   : > { %v2981_v13 = vpop.eup %2024  ;;  %1383 = vadd.xlane.f32.xlu1 %v2979_v52 }
 0x2c0   : > { %2030 = vpow2.f32 %v1349_v14  ;;  %1411 = vadd.xlane.f32.xlu0 %v2981_v13 }
 0x2c2   : > { %v2027_v34 = vpop.eup %2026 }
 0x2c3   : > { %v1356_v55 = vpop.xlane.xlu2 %1355  ;;  %v1358_v35 = vpop.xlane.xlu0 %1357  ;;  %v1449_v33 = vmul.f32 %v2027_v34, %v2864_v0 }
 0x2c4   : > { %2032 = vrcp.f32 %v1356_v55  ;;  %v2991_v10 = vpop.eup %2028 }
 0x2c5   : > { %2034 = vrcp.f32 %v1358_v35  ;;  %v1485_v27 = vmul.f32 %v2988_v22, %v1449_v33  ;;  %1415 = vadd.xlane.f32.xlu2 %v2991_v10 }
 0x2c6   : > { %v2994_v61 = vpop.eup %2030 }
 0x2c7   : > { %1413 = vadd.xlane.f32.xlu1 %v2994_v61 }
 0x2c8   : > { %1517 = vadd.xlane.f32.xlu0 %v1485_v27 }
 0x2ca   : > { %v2033_v14 = vpop.eup %2032 }
 0x2cb   : > { %v1360_v29 = vpop.xlane.xlu1 %1359  ;;  %v2035_v44 = vpop.eup %2034  ;;  %v1450_v0 = vmul.f32 %v2033_v14, %v2872_v56 }
 0x2cc   : > { %v1386_v5 = vpop.xlane.xlu2 %1385  ;;  %v1388_v7 = vpop.xlane.xlu0 %1387  ;;  %2036 = vrcp.f32 %v1360_v29  ;;  %v1451_v34 = vmul.f32 %v2035_v44, %v2874_v45 }
 0x2cd   : > { %2038 = vrcp.f32 %v1386_v5  ;;  %v1486_v55 = vmul.f32 %v2988_v22, %v1450_v0 }
 0x2ce   : > { %2040 = vrcp.f32 %v1388_v7  ;;  %v1487_v35 = vmul.f32 %v2988_v22, %v1451_v34 }
 0x2cf   : > { %1519 = vadd.xlane.f32.xlu1 %v1486_v55 }
 0x2d0   : > { %1521 = vadd.xlane.f32.xlu2 %v1487_v35 }
 0x2d2   : > { %v2037_v33 = vpop.eup %2036 }
 0x2d3   : > { %v2039_v27 = vpop.eup %2038  ;;  %v1390_v4 = vpop.xlane.xlu1 %1389  ;;  %v1452_v8 = vmul.f32 %v2037_v33, %v2881_v50 }
 0x2d4   : > { %v2041_v20 = vpop.eup %2040  ;;  %2042 = vrcp.f32 %v1390_v4  ;;  %v1465_v29 = vmul.f32 %v2039_v27, %v2879_v47 }
 0x2d5   : > { %v1466_v5 = vmul.f32 %v2041_v20, %v2883_v28  ;;  %v1488_v44 = vmul.f32 %v2988_v22, %v1452_v8 }
 0x2d6   : > { %v1501_v7 = vmul.f32 %v2988_v22, %v1465_v29 }
 0x2d7   : > { %v1502_v56 = vmul.f32 %v2988_v22, %v1466_v5  ;;  %1523 = vadd.xlane.f32.xlu0 %v1488_v44 }
 0x2d8   : > { %1549 = vadd.xlane.f32.xlu1 %v1501_v7 }
 0x2d9   : > { %1551 = vadd.xlane.f32.xlu2 %v1502_v56  ;;  %v1362_v45 = vpop.xlane.xlu2 %1361 }
 0x2da   : > { %v2043_v14 = vpop.eup %2042  ;;  %2044 = vrcp.f32 %v1362_v45 }
 0x2db   : > { %v1467_v50 = vmul.f32 %v2043_v14, %v2889_v39 }
 0x2dd   : > { %v1503_v4 = vmul.f32 %v2988_v22, %v1467_v50 }
 0x2df   : > { %1553 = vadd.xlane.f32.xlu0 %v1503_v4 }
 0x2e0   : > { %v2045_v47 = vpop.eup %2044 }
 0x2e1   : > { %v1392_v0 = vpop.xlane.xlu2 %1391  ;;  %v1453_v20 = vmul.f32 %v2045_v47, %v2894_v9 }
 0x2e2   : > { %2046 = vrcp.f32 %v1392_v0  ;;  %v1364_v8 = vpop.xlane.xlu0 %1363 }
 0x2e3   : > { %2048 = vrcp.f32 %v1364_v8  ;;  %v1489_v28 = vmul.f32 %v2988_v22, %v1453_v20 }
 0x2e5   : > { %1525 = vadd.xlane.f32.xlu1 %v1489_v28 }
 0x2e8   : > { %v2047_v34 = vpop.eup %2046 }
 0x2e9   : > { %v2049_v55 = vpop.eup %2048  ;;  %v1366_v35 = vpop.xlane.xlu1 %1365  ;;  %v1468_v33 = vmul.f32 %v2047_v34, %v2899_v49 }
 0x2ea   : > { %v1394_v27 = vpop.xlane.xlu0 %1393  ;;  %2050 = vrcp.f32 %v1366_v35  ;;  %v1454_v39 = vmul.f32 %v2049_v55, %v2901_v40 }
 0x2eb   : > { %2052 = vrcp.f32 %v1394_v27  ;;  %v1504_v29 = vmul.f32 %v2988_v22, %v1468_v33 }
 0x2ec   : > { %v1490_v9 = vmul.f32 %v2988_v22, %v1454_v39 }
 0x2ed   : > { %1555 = vadd.xlane.f32.xlu1 %v1504_v29 }
 0x2ee   : > { %1527 = vadd.xlane.f32.xlu2 %v1490_v9 }
 0x2f0   : > { %v2051_v5 = vpop.eup %2050 }
 0x2f1   : > { %v2053_v44 = vpop.eup %2052  ;;  %v1396_v7 = vpop.xlane.xlu1 %1395  ;;  %v1455_v56 = vmul.f32 %v2051_v5, %v2907_v48 }
 0x2f2   : > { %v1368_v45 = vpop.xlane.xlu2 %1367  ;;  %2054 = vrcp.f32 %v1396_v7  ;;  %v1469_v49 = vmul.f32 %v2053_v44, %v2909_v32 }
 0x2f3   : > { %2056 = vrcp.f32 %v1368_v45  ;;  %v1491_v14 = vmul.f32 %v2988_v22, %v1455_v56 }
 0x2f4   : > { %v1505_v40 = vmul.f32 %v2988_v22, %v1469_v49 }
 0x2f5   : > { %1529 = vadd.xlane.f32.xlu0 %v1491_v14 }
 0x2f6   : > { %1557 = vadd.xlane.f32.xlu2 %v1505_v40 }
 0x2f8   : > { %v2055_v50 = vpop.eup %2054 }
 0x2f9   : > { %v2057_v4 = vpop.eup %2056  ;;  %v1470_v47 = vmul.f32 %v2055_v50, %v2914_v24 }
 0x2fa   : > { %v1398_v0 = vpop.xlane.xlu2 %1397  ;;  %v1456_v20 = vmul.f32 %v2057_v4, %v2917_v23  ;;  %v1370_v48 = vpop.xlane.xlu0 %1369 }
 0x2fb   : > { %2058 = vrcp.f32 %v1398_v0  ;;  %v1506_v8 = vmul.f32 %v2988_v22, %v1470_v47 }
 0x2fc   : > { %2060 = vrcp.f32 %v1370_v48  ;;  %v1492_v32 = vmul.f32 %v2988_v22, %v1456_v20 }
 0x2fd   : > { %1559 = vadd.xlane.f32.xlu0 %v1506_v8 }
 0x2fe   : > { %1531 = vadd.xlane.f32.xlu1 %v1492_v32 }
 0x301   : > { %v2059_v28 = vpop.eup %2058 }
 0x302   : > { %v2061_v34 = vpop.eup %2060  ;;  %v1471_v55 = vmul.f32 %v2059_v28, %v2921_v38  ;;  %v1372_v35 = vpop.xlane.xlu1 %1371 }
 0x303   : > { %v1457_v33 = vmul.f32 %v2061_v34, %v2925_v11  ;;  %v1400_v24 = vpop.xlane.xlu0 %1399  ;;  %2062 = vrcp.f32 %v1372_v35 }
 0x304   : > { %v1507_v23 = vmul.f32 %v2988_v22, %v1471_v55  ;;  %2064 = vrcp.f32 %v1400_v24 }
 0x305   : > { %v1493_v27 = vmul.f32 %v2988_v22, %v1457_v33 }
 0x306   : > { %1561 = vadd.xlane.f32.xlu1 %v1507_v23 }
 0x307   : > { %1533 = vadd.xlane.f32.xlu2 %v1493_v27 }
 0x309   : > { %v2063_v39 = vpop.eup %2062 }
 0x30a   : > { %v2065_v29 = vpop.eup %2064  ;;  %v1402_v9 = vpop.xlane.xlu1 %1401  ;;  %v1458_v5 = vmul.f32 %v2063_v39, %v2931_v36 }
 0x30b   : > { %v1374_v44 = vpop.xlane.xlu2 %1373  ;;  %2066 = vrcp.f32 %v1402_v9  ;;  %v1472_v38 = vmul.f32 %v2065_v29, %v2933_v42 }
 0x30c   : > { %2068 = vrcp.f32 %v1374_v44  ;;  %v1494_v11 = vmul.f32 %v2988_v22, %v1458_v5  ;;  %v1581_v5 = vlaneseq }
 0x30d   : > { %v1508_v7 = vmul.f32 %v2988_v22, %v1472_v38 }
 0x30e   : > { %1535 = vadd.xlane.f32.xlu0 %v1494_v11 }
 0x30f   : > { %1563 = vadd.xlane.f32.xlu2 %v1508_v7 }
 0x311   : > { %v2067_v56 = vpop.eup %2066 }
 0x312   : > { %v2069_v45 = vpop.eup %2068  ;;  %v1473_v49 = vmul.f32 %v2067_v56, %v2939_v53 }
 0x313   : > { %v1404_v14 = vpop.xlane.xlu2 %1403  ;;  %v1376_v40 = vpop.xlane.xlu0 %1375  ;;  %v1459_v50 = vmul.f32 %v2069_v45, %v2941_v37  ;;  %v3051_v45 = vand.u32 127, %v1581_v5  ;;  %v3259_v5 = vld [vmem:[#allocation2_spill] sm:$0xff] }
 0x314   : > { %2070 = vrcp.f32 %v1404_v14  ;;  %v1509_v36 = vmul.f32 %v2988_v22, %v1473_v49 }
 0x315   : > { %2072 = vrcp.f32 %v1376_v40  ;;  %v1495_v42 = vmul.f32 %v2988_v22, %v1459_v50  ;;  %vm1583_vm0 = vcmp.eq.s32.totalorder %v3051_v45, 8 }
 0x316   : > { %1565 = vadd.xlane.f32.xlu0 %v1509_v36 }
 0x317   : > { %1537 = vadd.xlane.f32.xlu1 %v1495_v42 }
 0x31a   : > { %v2071_v4 = vpop.eup %2070  ;;  %v1378_v47 = vpop.xlane.xlu1 %1377 }
 0x31b   : > { %v2073_v0 = vpop.eup %2072  ;;  %v1406_v20 = vpop.xlane.xlu0 %1405  ;;  %2074 = vrcp.f32 %v1378_v47  ;;  %v1474_v48 = vmul.f32 %v2071_v4, %v2947_v54 }
 0x31c   : > { %2076 = vrcp.f32 %v1406_v20  ;;  %v1460_v53 = vmul.f32 %v2073_v0, %v2949_v41 }
 0x31d   : > { %v1510_v37 = vmul.f32 %v2988_v22, %v1474_v48 }
 0x31e   : > { %v1496_v8 = vmul.f32 %v2988_v22, %v1460_v53 }
 0x31f   : > { %1567 = vadd.xlane.f32.xlu1 %v1510_v37 }
 0x320   : > { %1539 = vadd.xlane.f32.xlu2 %v1496_v8 }
 0x321   : > { %v2075_v32 = vpop.eup %2074 }
 0x322   : > { %v2077_v28 = vpop.eup %2076  ;;  %v1408_v34 = vpop.xlane.xlu1 %1407  ;;  %v1461_v55 = vmul.f32 %v2075_v32, %v2955_v60 }
 0x323   : > { %v1380_v35 = vpop.xlane.xlu2 %1379  ;;  %2078 = vrcp.f32 %v1408_v34  ;;  %v1475_v33 = vmul.f32 %v2077_v28, %v2957_v59 }
 0x324   : > { %2080 = vrcp.f32 %v1380_v35  ;;  %v1497_v54 = vmul.f32 %v2988_v22, %v1461_v55 }
 0x325   : > { %v1511_v41 = vmul.f32 %v2988_v22, %v1475_v33 }
 0x326   : > { %1541 = vadd.xlane.f32.xlu0 %v1497_v54 }
 0x328   : > { %1569 = vadd.xlane.f32.xlu2 %v1511_v41 }
 0x329   : > { %v2079_v24 = vpop.eup %2078 }
 0x32a   : > { %v2081_v23 = vpop.eup %2080  ;;  %v1476_v27 = vmul.f32 %v2079_v24, %v2963_v15 }
 0x32b   : > { %v1410_v39 = vpop.xlane.xlu2 %1409  ;;  %v1382_v29 = vpop.xlane.xlu0 %1381  ;;  %v1462_v9 = vmul.f32 %v2081_v23, %v2965_v31 }
 0x32c   : > { %2082 = vrcp.f32 %v1410_v39  ;;  %v1512_v60 = vmul.f32 %v2988_v22, %v1476_v27 }
 0x32d   : > { %2084 = vrcp.f32 %v1382_v29  ;;  %v1498_v59 = vmul.f32 %v2988_v22, %v1462_v9 }
 0x32e   : > { %1571 = vadd.xlane.f32.xlu0 %v1512_v60 }
 0x32f   : > { %1543 = vadd.xlane.f32.xlu1 %v1498_v59 }
 0x332   : > { %v2083_v44 = vpop.eup %2082  ;;  %v1384_v38 = vpop.xlane.xlu1 %1383 }
 0x333   : > { %v2085_v11 = vpop.eup %2084  ;;  %v1412_v7 = vpop.xlane.xlu0 %1411  ;;  %2086 = vrcp.f32 %v1384_v38  ;;  %v1477_v15 = vmul.f32 %v2083_v44, %v2971_v2  ;;  %v3260_v38 = vld [vmem:[#allocation3_spill] sm:$0xff] }
 0x334   : > { %2088 = vrcp.f32 %v1412_v7  ;;  %v1463_v31 = vmul.f32 %v2085_v11, %v2973_v25 }
 0x335   : > { %v1513_v56 = vmul.f32 %v2988_v22, %v1477_v15 }
 0x336   : > { %v1499_v49 = vmul.f32 %v2988_v22, %v1463_v31  ;;  %v3262_v31 = vld [vmem:[#allocation5_spill] sm:$0xff] }
 0x337   : > { %1573 = vadd.xlane.f32.xlu1 %v1513_v56 }
 0x338   : > { %1545 = vadd.xlane.f32.xlu2 %v1499_v49  ;;  %v1416_v40 = vpop.xlane.xlu2 %1415 }
 0x339   : > { %v2087_v14 = vpop.eup %2086  ;;  %2090 = vrcp.f32 %v1416_v40 }
 0x33a   : > { %v2089_v50 = vpop.eup %2088  ;;  %v1414_v2 = vpop.xlane.xlu1 %1413  ;;  %v1464_v25 = vmul.f32 %v2087_v14, %v2979_v52  ;;  %v3263_v14 = vld [vmem:[#allocation7_spill] sm:$0xff] }
 0x33b   : > { %v1518_v36 = vpop.xlane.xlu0 %1517  ;;  %2092 = vrcp.f32 %v1414_v2  ;;  %v1478_v42 = vmul.f32 %v2089_v50, %v2981_v13  ;;  %v3264_v2 = vld [vmem:[#allocation6_spill] sm:$0xff] }
 0x33c   : > { %v1584_v4 = vsel %vm1583_vm0, %v1518_v36, %v2736_v30  ;;  %v1500_v47 = vmul.f32 %v2988_v22, %v1464_v25 }
 0x33d   : > { %1616 = vst [vmem:[%s3059_s24] sm:$0xff] %v1584_v4  ;;  %v1514_v0 = vmul.f32 %v2988_v22, %v1478_v42  ;;  %v3265_v42 = vld [vmem:[#allocation8_spill] sm:$0xff] }
 0x33e   : > { %1547 = vadd.xlane.f32.xlu0 %v1500_v47 }
 0x33f   : > { %v2091_v20 = vpop.eup %2090 }
 0x340   : > { %1575 = vadd.xlane.f32.xlu2 %v1514_v0  ;;  %v1480_v52 = vmul.f32 %v2091_v20, %v2991_v10  ;;  %v3266_v0 = vld [vmem:[#allocation9_spill] sm:$0xff] }
 0x341   : > { %v2093_v48 = vpop.eup %2092 }
 0x342   : > { %v1520_v53 = vpop.xlane.xlu1 %1519  ;;  %v1479_v13 = vmul.f32 %v2093_v48, %v2994_v61  ;;  %v1516_v8 = vmul.f32 %v2988_v22, %v1480_v52 }
 0x343   : > { %v1585_v30 = vsel %vm1583_vm0, %v1520_v53, %v2740_v19  ;;  %v1522_v37 = vpop.xlane.xlu2 %1521  ;;  %v3267_v53 = vld [vmem:[#allocation10_spill] sm:$0xff] }
 0x344   : > { %1617 = vst [vmem:[%s3059_s24 + $0x8] sm:$0xff] %v1585_v30  ;;  %v1586_v32 = vsel %vm1583_vm0, %v1522_v37, %v2747_v62  ;;  %v1515_v10 = vmul.f32 %v2988_v22, %v1479_v13  ;;  %1579 = vadd.xlane.f32.xlu1 %v1516_v8  ;;  %v3268_v30 = vld [vmem:[#allocation11_spill] sm:$0xff] }
 0x345   : > { %1618 = vst [vmem:[%s3059_s24 + $0x10] sm:$0xff] %v1586_v32  ;;  %v3269_v32 = vld [vmem:[#allocation13_spill] sm:$0xff] }
 0x346   : > { %1577 = vadd.xlane.f32.xlu0 %v1515_v10 }
 0x34a   : > { %v1524_v61 = vpop.xlane.xlu0 %1523 }
 0x34b   : > { %v1550_v28 = vpop.xlane.xlu1 %1549  ;;  %v1587_v19 = vsel %vm1583_vm0, %v1524_v61, %v2755_v18 }
 0x34c   : > { %v1600_v34 = vsel %vm1583_vm0, %v1550_v28, %v2744_v43  ;;  %v1552_v55 = vpop.xlane.xlu2 %1551  ;;  %1619 = vst [vmem:[%s3059_s24 + $0x18] sm:$0xff] %v1587_v19  ;;  %v3270_v28 = vld [vmem:[#allocation12_spill] sm:$0xff] }
 0x34d   : > { %1632 = vst [vmem:[%s3059_s24 + $0x80] sm:$0xff] %v1600_v34  ;;  %v1601_v62 = vsel %vm1583_vm0, %v1552_v55, %v2752_v12  ;;  %v3271_v55 = vld [vmem:[#allocation14_spill] sm:$0xff] }
 0x34e   : > { %1633 = vst [vmem:[%s3059_s24 + $0x88] sm:$0xff] %v1601_v62 }
 0x352   : > { %v1554_v22 = vpop.xlane.xlu0 %1553 }
 0x353   : > { %v1602_v18 = vsel %vm1583_vm0, %v1554_v22, %v2760_v16 }
 0x354   : > { %1634 = vst [vmem:[%s3059_s24 + $0x90] sm:$0xff] %v1602_v18  ;;  %v3272_v18 = vld [vmem:[#allocation15_spill] sm:$0xff] }
 0x358   : > { %v1526_v35 = vpop.xlane.xlu1 %1525 }
 0x359   : > { %v1588_v43 = vsel %vm1583_vm0, %v1526_v35, %v2764_v26 }
 0x35a   : > { %1620 = vst [vmem:[%s3059_s24 + $0x20] sm:$0xff] %v1588_v43 }
 0x360   : > { %v1556_v33 = vpop.xlane.xlu1 %1555 }
 0x361   : > { %v1528_v54 = vpop.xlane.xlu2 %1527  ;;  %v1603_v12 = vsel %vm1583_vm0, %v1556_v33, %v2768_v17 }
 0x362   : > { %v1589_v16 = vsel %vm1583_vm0, %v1528_v54, %v2771_v58  ;;  %1635 = vst [vmem:[%s3059_s24 + $0x98] sm:$0xff] %v1603_v12 }
 0x363   : > { %1621 = vst [vmem:[%s3059_s24 + $0x28] sm:$0xff] %v1589_v16 }
 0x368   : > { %v1530_v41 = vpop.xlane.xlu0 %1529 }
 0x369   : > { %v1558_v24 = vpop.xlane.xlu2 %1557  ;;  %v1590_v26 = vsel %vm1583_vm0, %v1530_v41, %v2779_v51 }
 0x36a   : > { %v1604_v23 = vsel %vm1583_vm0, %v1558_v24, %v2776_v6  ;;  %1622 = vst [vmem:[%s3059_s24 + $0x30] sm:$0xff] %v1590_v26 }
 0x36b   : > { %1636 = vst [vmem:[%s3059_s24 + $0xa0] sm:$0xff] %v1604_v23 }
 0x370   : > { %v1560_v17 = vpop.xlane.xlu0 %1559 }
 0x371   : > { %v1605_v58 = vsel %vm1583_vm0, %v1560_v17, %v2784_v3  ;;  %v1532_v27 = vpop.xlane.xlu1 %1531 }
 0x372   : > { %1637 = vst [vmem:[%s3059_s24 + $0xa8] sm:$0xff] %v1605_v58  ;;  %v1591_v39 = vsel %vm1583_vm0, %v1532_v27, %v2787_v63 }
 0x373   : > { %1623 = vst [vmem:[%s3059_s24 + $0x38] sm:$0xff] %v1591_v39 }
 0x379   : > { %v1562_v51 = vpop.xlane.xlu1 %1561 }
 0x37a   : > { %v1534_v29 = vpop.xlane.xlu2 %1533  ;;  %v1606_v6 = vsel %vm1583_vm0, %v1562_v51, %v2792_v1 }
 0x37b   : > { %v1592_v3 = vsel %vm1583_vm0, %v1534_v29, %v2795_v57  ;;  %1638 = vst [vmem:[%s3059_s24 + $0xb0] sm:$0xff] %v1606_v6 }
 0x37c   : > { %1624 = vst [vmem:[%s3059_s24 + $0x40] sm:$0xff] %v1592_v3 }
 0x381   : > { %v1536_v9 = vpop.xlane.xlu0 %1535 }
 0x382   : > { %v1564_v60 = vpop.xlane.xlu2 %1563  ;;  %v1593_v63 = vsel %vm1583_vm0, %v1536_v9, %v2803_v46 }
 0x383   : > { %v1607_v59 = vsel %vm1583_vm0, %v1564_v60, %v2800_v21  ;;  %1625 = vst [vmem:[%s3059_s24 + $0x48] sm:$0xff] %v1593_v63  ;;  %v3261_v21 = vld [vmem:[#allocation4_spill] sm:$0xff] }
 0x384   : > { %1639 = vst [vmem:[%s3059_s24 + $0xb8] sm:$0xff] %v1607_v59 }
 0x389   : > { %v1566_v1 = vpop.xlane.xlu0 %1565 }
 0x38a   : > { %v1608_v57 = vsel %vm1583_vm0, %v1566_v1, %v3259_v5  ;;  %v1538_v44 = vpop.xlane.xlu1 %1537 }
 0x38b   : > { %1640 = vst [vmem:[%s3059_s24 + $0xc0] sm:$0xff] %v1608_v57  ;;  %v1594_v11 = vsel %vm1583_vm0, %v1538_v44, %v3260_v38 }
 0x38c   : > { %1626 = vst [vmem:[%s3059_s24 + $0x50] sm:$0xff] %v1594_v11 }
 0x392   : > { %v1568_v46 = vpop.xlane.xlu1 %1567 }
 0x393   : > { %v1540_v7 = vpop.xlane.xlu2 %1539  ;;  %v1609_v15 = vsel %vm1583_vm0, %v1568_v46, %v3261_v21 }
 0x394   : > { %v1595_v56 = vsel %vm1583_vm0, %v1540_v7, %v3262_v31  ;;  %1641 = vst [vmem:[%s3059_s24 + $0xc8] sm:$0xff] %v1609_v15 }
 0x395   : > { %1627 = vst [vmem:[%s3059_s24 + $0x58] sm:$0xff] %v1595_v56 }
 0x399   : > { %v1542_v49 = vpop.xlane.xlu0 %1541 }
 0x39a   : > { %v1596_v40 = vsel %vm1583_vm0, %v1542_v49, %v3263_v14 }
 0x39b   : > { %v1570_v50 = vpop.xlane.xlu2 %1569  ;;  %1628 = vst [vmem:[%s3059_s24 + $0x60] sm:$0xff] %v1596_v40 }
 0x39c   : > { %v1610_v25 = vsel %vm1583_vm0, %v1570_v50, %v3264_v2 }
 0x39d   : > { %1642 = vst [vmem:[%s3059_s24 + $0xd0] sm:$0xff] %v1610_v25 }
 0x3a1   : > { %v1572_v36 = vpop.xlane.xlu0 %1571 }
 0x3a2   : > { %v1611_v4 = vsel %vm1583_vm0, %v1572_v36, %v3265_v42  ;;  %v1544_v47 = vpop.xlane.xlu1 %1543 }
 0x3a3   : > { %1643 = vst [vmem:[%s3059_s24 + $0xd8] sm:$0xff] %v1611_v4  ;;  %v1597_v20 = vsel %vm1583_vm0, %v1544_v47, %v3266_v0 }
 0x3a4   : > { %1629 = vst [vmem:[%s3059_s24 + $0x68] sm:$0xff] %v1597_v20 }
 0x3aa   : > { %v1574_v48 = vpop.xlane.xlu1 %1573 }
 0x3ab   : > { %v1546_v52 = vpop.xlane.xlu2 %1545  ;;  %v1612_v13 = vsel %vm1583_vm0, %v1574_v48, %v3267_v53 }
 0x3ac   : > { %v1598_v37 = vsel %vm1583_vm0, %v1546_v52, %v3268_v30  ;;  %1644 = vst [vmem:[%s3059_s24 + $0xe0] sm:$0xff] %v1612_v13 }
 0x3ad   : > { %1630 = vst [vmem:[%s3059_s24 + $0x70] sm:$0xff] %v1598_v37 }
 0x3b1   : > { %v1548_v8 = vpop.xlane.xlu0 %1547 }
 0x3b2   : > { %v1599_v10 = vsel %vm1583_vm0, %v1548_v8, %v3269_v32 }
 0x3b3   : > { %v1576_v61 = vpop.xlane.xlu2 %1575  ;;  %1631 = vst [vmem:[%s3059_s24 + $0x78] sm:$0xff] %v1599_v10 }
 0x3b4   : > { %v1613_v19 = vsel %vm1583_vm0, %v1576_v61, %v3270_v28 }
 0x3b5   : > { %1645 = vst [vmem:[%s3059_s24 + $0xe8] sm:$0xff] %v1613_v19 }
 0x3b7   : > { %v1580_v34 = vpop.xlane.xlu1 %1579 }
 0x3b8   : > { %v1615_v62 = vsel %vm1583_vm0, %v1580_v34, %v3271_v55 }
 0x3b9   : > { %v1578_v22 = vpop.xlane.xlu0 %1577  ;;  %1647 = vst [vmem:[%s3059_s24 + $0xf8] sm:$0xff] %v1615_v62 }
 0x3ba   : > { %v1614_v35 = vsel %vm1583_vm0, %v1578_v22, %v3272_v18 }
 0x3bb   : > { %1646 = vst [vmem:[%s3059_s24 + $0xf0] sm:$0xff] %v1614_v35 }
 0x3bc PF: > { %s16_s21 = sadd.s32 1, %s2100_s21  }
 0x3bd   : > { %p13_p4 = scmp.ge.s32.totalorder %s16_s21, 4  }
 0x3bf   :  { %15 = sbr.rel (!%p13_p4) target bundleno = 1 (0x1), region = 74 }

</bundles_post_ra>
